<compile_context>
chip_gen: v5e
topology: v5e:2x2
jax: 0.10.0
libtpu: 0.0.40
codegen_flags: <defaults>
</compile_context>

<pallas_src>
import jax
import jax.numpy as jnp
from jax.experimental import pallas as pl
from jax.experimental.pallas import tpu as pltpu


def prism_kernel(x_ref,
                 we1_ref, be1_ref, we2_ref, be2_ref,
                 wd1_ref, bd1_ref, wd2_ref, bd2_ref,
                 y_ref, dot_ref):
    """Fused encoder->decoder forward (+ reconstruction row-dot) on one batch tile."""
    x = x_ref[...]  # bf16 (tb, d_in) straight off HBM, no in-kernel cast needed

    # ---- encoder ----  (bf16 MXU matmuls, f32 accumulation; bias + tanh in f32)
    h = jnp.dot(x, we1_ref[...], preferred_element_type=jnp.float32) + be1_ref[...]
    h = jnp.tanh(h)
    z = jnp.dot(h.astype(jnp.bfloat16), we2_ref[...],
                preferred_element_type=jnp.float32) + be2_ref[...]

    # ---- decoder ----
    g = jnp.tanh(jnp.dot(z.astype(jnp.bfloat16), wd1_ref[...],
                         preferred_element_type=jnp.float32) + bd1_ref[...])
    y = jnp.dot(g.astype(jnp.bfloat16), wd2_ref[...],
                preferred_element_type=jnp.float32) + bd2_ref[...]

    # Lane-dense bf16 output store.
    y_ref[...] = y.astype(y_ref.dtype)

    # Fused reconstruction-loss epilogue: per-row dot of y with x in f32,
    # computed while both are resident in VMEM (saves an HBM re-read + launch).
    dot_ref[...] = jnp.sum(y * x.astype(jnp.float32), axis=-1, keepdims=True)


def prism_forward(x, params, *, batch_tile=256):
    """Run the fused PrISM forward pass via pallas_call.

    x: (B, d_in) bfloat16 (or float32), d_in a multiple of 128.
    params: dict of transposed bf16 weights (in, out) and f32 biases (1, out).
    Returns (y, rowdot): y is (B, d_in) bf16, rowdot is (B, 1) f32 with
    rowdot[b] = sum_i y[b, i] * x[b, i].

    batch_tile=256 gives grid=(2,) at B=512: one step per TensorCore on v7x and
    only two steps of pipeline overhead on single-TC v5e/v6e. On v5e/v6e you may
    pass batch_tile=B for grid=(1,); VMEM use is <4 MiB either way.
    """
    B, d_in = x.shape
    we1, be1 = params["we1"], params["be1"]
    we2, be2 = params["we2"], params["be2"]
    wd1, bd1 = params["wd1"], params["bd1"]
    wd2, bd2 = params["wd2"], params["bd2"]
    hidden = we1.shape[1]
    latent = we2.shape[1]

    tb = min(batch_tile, B)
    assert B % tb == 0 and tb % 8 == 0, "batch tile must divide B and align to 8"
    grid = (B // tb,)

    # Weight/bias blocks are the full arrays with a constant index_map, so they
    # are DMA'd once and stay resident in VMEM across the whole batch grid.
    def full_spec(arr):
        return pl.BlockSpec(arr.shape, lambda i: (0, 0))

    flops = 2 * B * (d_in * hidden + hidden * latent + latent * hidden + hidden * d_in)
    flops += 2 * B * d_in  # fused row-dot epilogue
    transcendentals = 2 * B * hidden  # two tanh layers of width `hidden`
    bytes_accessed = (
        x.size * x.dtype.itemsize                       # x in (bf16)
        + B * d_in * 2                                  # y out (bf16)
        + B * 4                                         # rowdot out (f32)
        + sum(int(a.size) * a.dtype.itemsize
              for a in (we1, be1, we2, be2, wd1, bd1, wd2, bd2)))

    y, rowdot = pl.pallas_call(
        prism_kernel,
        out_shape=(
            jax.ShapeDtypeStruct((B, d_in), jnp.bfloat16),  # y  (lane-dense)
            jax.ShapeDtypeStruct((B, 1), jnp.float32),      # fused row-dot
        ),
        grid_spec=pltpu.PrefetchScalarGridSpec(
            num_scalar_prefetch=0,
            grid=grid,
            in_specs=[
                pl.BlockSpec((tb, d_in), lambda i: (i, 0)),   # x tile (pipelined)
                full_spec(we1), full_spec(be1),
                full_spec(we2), full_spec(be2),
                full_spec(wd1), full_spec(bd1),
                full_spec(wd2), full_spec(bd2),
            ],
            out_specs=[
                pl.BlockSpec((tb, d_in), lambda i: (i, 0)),   # y tile
                pl.BlockSpec((tb, 1), lambda i: (i, 0)),      # rowdot tile
            ],
        ),
        compiler_params=pltpu.CompilerParams(
            dimension_semantics=("parallel",),      # megacore split on v7x
            vmem_limit_bytes=32 * 1024 * 1024),
        cost_estimate=pl.CostEstimate(
            flops=flops,
            transcendentals=transcendentals,
            bytes_accessed=bytes_accessed),
    )(x, we1, be1, we2, be2, wd1, bd1, wd2, bd2)
    return y, rowdot


def prism_reconstruction_loss(rowdot):
    """1 - mean_b sum_i y[b,i] x[b,i], using the kernel's fused row-dot output."""
    return 1.0 - rowdot.mean()


# ----------------------- parameter construction (glue) -----------------------

def xavier_uniform(key, fan_out, fan_in, dtype=jnp.float32):
    """Matches torch.nn.init.xavier_uniform_ on a (fan_out, fan_in) weight."""
    bound = float(jnp.sqrt(6.0 / (fan_in + fan_out)))
    return jax.random.uniform(key, (fan_out, fan_in), dtype,
                              minval=-bound, maxval=bound)


def linear_bias(key, fan_in, fan_out, dtype=jnp.float32):
    """nn.Linear default bias init U(+-1/sqrt(fan_in)); PrISM.reset_parameters
    only re-inits dim>1 params, so biases keep this distribution."""
    bound = 1.0 / float(jnp.sqrt(float(fan_in)))
    return jax.random.uniform(key, (1, fan_out), dtype,
                              minval=-bound, maxval=bound)


def make_params(key, d_in, hidden, latent):
    ks = jax.random.split(key, 8)
    # Weights stored PyTorch-style as (out, in), xavier-uniform (reset_parameters),
    # transposed to (in, out) for the kernel and cast to bf16 for the MXU.
    w_e1 = xavier_uniform(ks[0], hidden, d_in)
    w_e2 = xavier_uniform(ks[1], latent, hidden)
    w_d1 = xavier_uniform(ks[2], hidden, latent)
    w_d2 = xavier_uniform(ks[3], d_in, hidden)
    return {
        "we1": w_e1.T.astype(jnp.bfloat16), "be1": linear_bias(ks[4], d_in, hidden),
        "we2": w_e2.T.astype(jnp.bfloat16), "be2": linear_bias(ks[5], hidden, latent),
        "wd1": w_d1.T.astype(jnp.bfloat16), "bd1": linear_bias(ks[6], latent, hidden),
        "wd2": w_d2.T.astype(jnp.bfloat16), "bd2": linear_bias(ks[7], hidden, d_in),
    }


def prism_reference(x, p):
    """Plain-JAX reference of the same forward (same bf16/f32 precision path),
    returning f32 (pre output-rounding)."""
    xb = x.astype(jnp.bfloat16)
    h = jnp.tanh(jnp.dot(xb, p["we1"], preferred_element_type=jnp.float32) + p["be1"])
    z = jnp.dot(h.astype(jnp.bfloat16), p["we2"],
                preferred_element_type=jnp.float32) + p["be2"]
    g = jnp.tanh(jnp.dot(z.astype(jnp.bfloat16), p["wd1"],
                         preferred_element_type=jnp.float32) + p["bd1"])
    return jnp.dot(g.astype(jnp.bfloat16), p["wd2"],
                   preferred_element_type=jnp.float32) + p["bd2"]


if __name__ == "__main__":
    key = jax.random.PRNGKey(0)
    k_x, k_p = jax.random.split(key)

    # Lane-aligned feature dims (128-multiples); batch 512 tiled 256 -> grid=(2,).
    B, d_in, hidden, latent = 512, 128, 256, 128
    # bf16 activations at the HBM boundary (halves x/y DMA traffic).
    x = jax.random.normal(k_x, (B, d_in), jnp.float32).astype(jnp.bfloat16)
    params = make_params(k_p, d_in, hidden, latent)

    y, rowdot = prism_forward(x, params, batch_tile=256)
    (y, rowdot) = jax.block_until_ready((y, rowdot))

    y_ref = prism_reference(x, params)
    assert y.shape == (B, d_in) and y.dtype == jnp.bfloat16
    assert rowdot.shape == (B, 1)
    # bf16 output rounding (+ MXU vs XLA accumulation order) bounds the error.
    assert jnp.allclose(y.astype(jnp.float32), y_ref, atol=2e-2, rtol=2e-2)

    # Fused reconstruction loss vs plain-JAX loss on the f32 reference output.
    loss = prism_reconstruction_loss(rowdot)
    loss_ref = 1.0 - jnp.einsum("...i,...i->...", y_ref,
                                x.astype(jnp.float32)).mean()
    assert jnp.allclose(loss, loss_ref, atol=2e-2, rtol=2e-2)
    jax.block_until_ready(loss)

    print("KERNEL_OK")
</pallas_src>

<mosaic_0001>
module attributes {stable_mosaic.version = 11 : i64} {
  func.func @prism_kernel(%arg0: i32, %arg1: memref<256x128xbf16, #tpu.memory_space<vmem>>, %arg2: memref<128x256xbf16, #tpu.memory_space<vmem>>, %arg3: memref<1x256xf32, #tpu.memory_space<vmem>>, %arg4: memref<256x128xbf16, #tpu.memory_space<vmem>>, %arg5: memref<1x128xf32, #tpu.memory_space<vmem>>, %arg6: memref<128x256xbf16, #tpu.memory_space<vmem>>, %arg7: memref<1x256xf32, #tpu.memory_space<vmem>>, %arg8: memref<256x128xbf16, #tpu.memory_space<vmem>>, %arg9: memref<1x128xf32, #tpu.memory_space<vmem>>, %arg10: memref<256x128xbf16, #tpu.memory_space<vmem>>, %arg11: memref<256x1xf32, #tpu.memory_space<vmem>>) attributes {dimension_semantics = [#tpu.dimension_semantics<parallel>], iteration_bounds = array<i64: 2>, scalar_prefetch = 0 : i64, scratch_operands = 0 : i64, tpu.core_type = #tpu.core_type<tc>, window_params = [{transform_indices = @transform_0, window_bounds = array<i64: 256, 128>}, {pipeline_mode = #tpu.pipeline_mode<synchronous>, transform_indices = @transform_1, window_bounds = array<i64: 128, 256>}, {pipeline_mode = #tpu.pipeline_mode<synchronous>, transform_indices = @transform_2, window_bounds = array<i64: 1, 256>}, {pipeline_mode = #tpu.pipeline_mode<synchronous>, transform_indices = @transform_3, window_bounds = array<i64: 256, 128>}, {pipeline_mode = #tpu.pipeline_mode<synchronous>, transform_indices = @transform_4, window_bounds = array<i64: 1, 128>}, {pipeline_mode = #tpu.pipeline_mode<synchronous>, transform_indices = @transform_5, window_bounds = array<i64: 128, 256>}, {pipeline_mode = #tpu.pipeline_mode<synchronous>, transform_indices = @transform_6, window_bounds = array<i64: 1, 256>}, {pipeline_mode = #tpu.pipeline_mode<synchronous>, transform_indices = @transform_7, window_bounds = array<i64: 256, 128>}, {pipeline_mode = #tpu.pipeline_mode<synchronous>, transform_indices = @transform_8, window_bounds = array<i64: 1, 128>}, {transform_indices = @transform_9, window_bounds = array<i64: 256, 128>}, {transform_indices = @transform_10, window_bounds = array<i64: 256, 1>}]} {
    %c0 = arith.constant 0 : index
    %c0_0 = arith.constant 0 : index
    %0 = vector.load %arg1[%c0, %c0_0] : memref<256x128xbf16, #tpu.memory_space<vmem>>, vector<256x128xbf16>
    %c0_1 = arith.constant 0 : index
    %c0_2 = arith.constant 0 : index
    %1 = vector.load %arg2[%c0_1, %c0_2] : memref<128x256xbf16, #tpu.memory_space<vmem>>, vector<128x256xbf16>
    %cst = arith.constant dense<0.000000e+00> : vector<256x256xf32>
    %2 = tpu.matmul %0, %1, %cst {dimension_numbers = #tpu.dot_dimension_numbers<[1], [0], [0], [1], [0, 0, 1, 1], [], []>} : vector<256x128xbf16>, vector<128x256xbf16>, vector<256x256xf32> -> vector<256x256xf32>
    %c0_3 = arith.constant 0 : index
    %c0_4 = arith.constant 0 : index
    %3 = vector.load %arg3[%c0_3, %c0_4] : memref<1x256xf32, #tpu.memory_space<vmem>>, vector<1x256xf32>
    %4 = vector.broadcast %3 : vector<1x256xf32> to vector<256x256xf32>
    %5 = arith.addf %2, %4 : vector<256x256xf32>
    %6 = math.tanh %5 : vector<256x256xf32>
    %7 = arith.truncf %6 : vector<256x256xf32> to vector<256x256xbf16>
    %c0_5 = arith.constant 0 : index
    %c0_6 = arith.constant 0 : index
    %8 = vector.load %arg4[%c0_5, %c0_6] : memref<256x128xbf16, #tpu.memory_space<vmem>>, vector<256x128xbf16>
    %cst_7 = arith.constant dense<0.000000e+00> : vector<256x128xf32>
    %9 = tpu.matmul %7, %8, %cst_7 {dimension_numbers = #tpu.dot_dimension_numbers<[1], [0], [0], [1], [0, 0, 1, 1], [], []>} : vector<256x256xbf16>, vector<256x128xbf16>, vector<256x128xf32> -> vector<256x128xf32>
    %c0_8 = arith.constant 0 : index
    %c0_9 = arith.constant 0 : index
    %10 = vector.load %arg5[%c0_8, %c0_9] : memref<1x128xf32, #tpu.memory_space<vmem>>, vector<1x128xf32>
    %11 = vector.broadcast %10 : vector<1x128xf32> to vector<256x128xf32>
    %12 = arith.addf %9, %11 : vector<256x128xf32>
    %13 = arith.truncf %12 : vector<256x128xf32> to vector<256x128xbf16>
    %c0_10 = arith.constant 0 : index
    %c0_11 = arith.constant 0 : index
    %14 = vector.load %arg6[%c0_10, %c0_11] : memref<128x256xbf16, #tpu.memory_space<vmem>>, vector<128x256xbf16>
    %cst_12 = arith.constant dense<0.000000e+00> : vector<256x256xf32>
    %15 = tpu.matmul %13, %14, %cst_12 {dimension_numbers = #tpu.dot_dimension_numbers<[1], [0], [0], [1], [0, 0, 1, 1], [], []>} : vector<256x128xbf16>, vector<128x256xbf16>, vector<256x256xf32> -> vector<256x256xf32>
    %c0_13 = arith.constant 0 : index
    %c0_14 = arith.constant 0 : index
    %16 = vector.load %arg7[%c0_13, %c0_14] : memref<1x256xf32, #tpu.memory_space<vmem>>, vector<1x256xf32>
    %17 = vector.broadcast %16 : vector<1x256xf32> to vector<256x256xf32>
    %18 = arith.addf %15, %17 : vector<256x256xf32>
    %19 = math.tanh %18 : vector<256x256xf32>
    %20 = arith.truncf %19 : vector<256x256xf32> to vector<256x256xbf16>
    %c0_15 = arith.constant 0 : index
    %c0_16 = arith.constant 0 : index
    %21 = vector.load %arg8[%c0_15, %c0_16] : memref<256x128xbf16, #tpu.memory_space<vmem>>, vector<256x128xbf16>
    %cst_17 = arith.constant dense<0.000000e+00> : vector<256x128xf32>
    %22 = tpu.matmul %20, %21, %cst_17 {dimension_numbers = #tpu.dot_dimension_numbers<[1], [0], [0], [1], [0, 0, 1, 1], [], []>} : vector<256x256xbf16>, vector<256x128xbf16>, vector<256x128xf32> -> vector<256x128xf32>
    %c0_18 = arith.constant 0 : index
    %c0_19 = arith.constant 0 : index
    %23 = vector.load %arg9[%c0_18, %c0_19] : memref<1x128xf32, #tpu.memory_space<vmem>>, vector<1x128xf32>
    %24 = vector.broadcast %23 : vector<1x128xf32> to vector<256x128xf32>
    %25 = arith.addf %22, %24 : vector<256x128xf32>
    %26 = arith.truncf %25 : vector<256x128xf32> to vector<256x128xbf16>
    %c0_20 = arith.constant 0 : index
    %c0_21 = arith.constant 0 : index
    %27 = vector.load %arg10[%c0_20, %c0_21] : memref<256x128xbf16, #tpu.memory_space<vmem>>, vector<256x128xbf16>
    tpu.vector_store %arg10[%c0_20, %c0_21], %26 {strides = array<i32>} : memref<256x128xbf16, #tpu.memory_space<vmem>>, vector<256x128xbf16>,
    %28 = arith.extf %0 : vector<256x128xbf16> to vector<256x128xf32>
    %29 = arith.mulf %25, %28 : vector<256x128xf32>
    %cst_22 = arith.constant dense<0.000000e+00> : vector<256xf32>
    %30 = vector.multi_reduction <add>, %29, %cst_22 [1] : vector<256x128xf32> to vector<256xf32>
    %31 = vector.shape_cast %30 : vector<256xf32> to vector<256x1xf32>
    %c0_23 = arith.constant 0 : index
    %c0_24 = arith.constant 0 : index
    %32 = vector.load %arg11[%c0_23, %c0_24] : memref<256x1xf32, #tpu.memory_space<vmem>>, vector<256x1xf32>
    tpu.vector_store %arg11[%c0_23, %c0_24], %31 {strides = array<i32>} : memref<256x1xf32, #tpu.memory_space<vmem>>, vector<256x1xf32>,
    return
  }
  func.func @transform_0(%arg0: i32) -> (i32, i32) {
    %c0_i32 = arith.constant 0 : i32
    %c0_i32_0 = arith.constant 0 : i32
    return %arg0, %c0_i32 : i32, i32
  }
  func.func @transform_1(%arg0: i32) -> (i32, i32) {
    %c0_i32 = arith.constant 0 : i32
    %c0_i32_0 = arith.constant 0 : i32
    %c0_i32_1 = arith.constant 0 : i32
    return %c0_i32, %c0_i32_0 : i32, i32
  }
  func.func @transform_2(%arg0: i32) -> (i32, i32) {
    %c0_i32 = arith.constant 0 : i32
    %c0_i32_0 = arith.constant 0 : i32
    %c0_i32_1 = arith.constant 0 : i32
    return %c0_i32, %c0_i32_0 : i32, i32
  }
  func.func @transform_3(%arg0: i32) -> (i32, i32) {
    %c0_i32 = arith.constant 0 : i32
    %c0_i32_0 = arith.constant 0 : i32
    %c0_i32_1 = arith.constant 0 : i32
    return %c0_i32, %c0_i32_0 : i32, i32
  }
  func.func @transform_4(%arg0: i32) -> (i32, i32) {
    %c0_i32 = arith.constant 0 : i32
    %c0_i32_0 = arith.constant 0 : i32
    %c0_i32_1 = arith.constant 0 : i32
    return %c0_i32, %c0_i32_0 : i32, i32
  }
  func.func @transform_5(%arg0: i32) -> (i32, i32) {
    %c0_i32 = arith.constant 0 : i32
    %c0_i32_0 = arith.constant 0 : i32
    %c0_i32_1 = arith.constant 0 : i32
    return %c0_i32, %c0_i32_0 : i32, i32
  }
  func.func @transform_6(%arg0: i32) -> (i32, i32) {
    %c0_i32 = arith.constant 0 : i32
    %c0_i32_0 = arith.constant 0 : i32
    %c0_i32_1 = arith.constant 0 : i32
    return %c0_i32, %c0_i32_0 : i32, i32
  }
  func.func @transform_7(%arg0: i32) -> (i32, i32) {
    %c0_i32 = arith.constant 0 : i32
    %c0_i32_0 = arith.constant 0 : i32
    %c0_i32_1 = arith.constant 0 : i32
    return %c0_i32, %c0_i32_0 : i32, i32
  }
  func.func @transform_8(%arg0: i32) -> (i32, i32) {
    %c0_i32 = arith.constant 0 : i32
    %c0_i32_0 = arith.constant 0 : i32
    %c0_i32_1 = arith.constant 0 : i32
    return %c0_i32, %c0_i32_0 : i32, i32
  }
  func.func @transform_9(%arg0: i32) -> (i32, i32) {
    %c0_i32 = arith.constant 0 : i32
    %c0_i32_0 = arith.constant 0 : i32
    return %arg0, %c0_i32 : i32, i32
  }
  func.func @transform_10(%arg0: i32) -> (i32, i32) {
    %c0_i32 = arith.constant 0 : i32
    %c0_i32_0 = arith.constant 0 : i32
    return %arg0, %c0_i32 : i32, i32
  }
}

</mosaic_0001>

<bundles_post_ra>
// kernel: tpu_custom_call.1
= control target key start
LH: loop header
LB: loop body
LE: loop exit
PB: predicated region body
PF: predicated region fallthrough
CT: control target
= control target key end

     0   :  { %s4118_s0 = inlined_call_operand.hbm [shape: bf16[512,128], index: 0, kind: input, shape index: {}]   ;;  %s4119_s1 = inlined_call_operand.hbm [shape: bf16[128,256], index: 1, kind: input, shape index: {}]   ;;  %s4120_s2 = inlined_call_operand.hbm [shape: f32[1,256], index: 2, kind: input, shape index: {}]   ;;  %s4121_s3 = inlined_call_operand.hbm [shape: bf16[256,128], index: 3, kind: input, shape index: {}]   ;;  %s4122_s4 = inlined_call_operand.vmem [shape: f32[1,128], index: 4, kind: input, shape index: {}]   ;;  %s4123_s5 = inlined_call_operand.hbm [shape: bf16[128,256], index: 5, kind: input, shape index: {}]   ;;  %s4124_s6 = inlined_call_operand.vmem [shape: f32[1,256], index: 6, kind: input, shape index: {}]   ;;  %s4125_s7 = inlined_call_operand.hbm [shape: bf16[256,128], index: 7, kind: input, shape index: {}]   ;;  %s4126_s8 = inlined_call_operand.vmem [shape: f32[1,128], index: 8, kind: input, shape index: {}]   ;;  %s4127_s9 = inlined_call_operand.hbm [shape: bf16[512,128], index: 9, kind: output, shape index: {0}]   ;;  %s4128_s10 = inlined_call_operand.vmem [shape: f32[512,1], index: 10, kind: output, shape index: {1}]  }
   0x1   :  { %4131 = sst [smem:[#allocation19_spill]] %s4119_s1 }
   0x2   :  { %4132 = sst [smem:[#allocation20_spill]] %s4120_s2 }
   0x3   :  { %4133 = sst [smem:[#allocation21_spill]] %s4121_s3 }
   0x4   :  { %4134 = sst [smem:[#allocation22_spill]] %s4123_s5 }
   0x5   :  { %16 = vsyncpa [#allocation3], 0 }
   0x6   :  { %18 = vsyncpa [#allocation3 + $0x1], 0 }
   0x7   :  { %19 = vsyncpa [#allocation6], 0 }
   0x8   :  { %20 = vsyncpa [#allocation9], 0 }
   0x9   :  { %21 = vsyncpa [#allocation12], 0 }
   0xa   :  { %22 = vsyncpa [#allocation4], 0 }
   0xb   :  { %24 = vsyncpa [#allocation4 + $0x1], 0  ;;  %s3599_s13 = smov 0   ;;  %s3601_s14 = smov 0  }
   0xc   :  { %s3603_s15 = smov 0   ;;  %s3605_s16 = smov 0  }
   0xd LB: > { %s4135_s1 = sld [smem:[#allocation19_spill]]  ;;  %s3623_s20 = sadd.s32 4294967295, %s3531_s16   ;;  %s3531_s16 = sphi %s3605_s16, %s4151_s16   ;;  %s3527_s15 = sphi %s3603_s15, %s4150_s15   ;;  %s3523_s14 = sphi %s3601_s14, %s4149_s14   ;;  %s3519_s13 = sphi %s3599_s13, %s4148_s13  }
   0xe   : > { %p2390_p0 = scmp.ge.s32.totalorder %s3531_s16, 1  ;;  %p51_p1 = scmp.eq.s32.totalorder %s3623_s20, 0 }
   0xf   : > { %p281_p2 = scmp.lt.s32.totalorder %s3531_s16, 3  ;;  %s3533_s22 = smov [#allocation5]  }
  0x10   : > { %s294_s23 = sshll.u32 %s3533_s22, 4  ;;  %s4137_s3 = sld [smem:[#allocation21_spill]]  ;;  %s295_s23 = int_to_ptr.vmem [resolvable:$true] %s294_s23 }
  0x11   : > { %p3628_p3 = pnand %p2390_p0, %p281_p2  ;;  %s3534_s28 = smov [#allocation8]  }
  0x12   : > { %s320_s29 = sshll.u32 %s3534_s28, 4  ;;  %s3535_s30 = smov 128   ;;  %s321_s29 = int_to_ptr.vmem [resolvable:$true] %s320_s29 }
  0x13   : > { %s292_s19 = sshll.u32 %s4135_s1, 4  ;;  %p2936_p4 = pneg %p3628_p3  ;;  %s293_s19 = int_to_ptr.hbm [resolvable:$true] %s292_s19 }
  0x14   : > { %s3536_s11 = smov 8   ;;  %s4129_s12 = smov 64  }
  0x15   : > { %p3640_p6 = pnand %p2936_p4, %p51_p1  ;;  %s4130_s17 = smov 4  }
  0x16   : > { %s318_s26 = sshll.u32 %s4137_s3, 4  ;;  %s4139_s2 = sld [smem:[#allocation20_spill]]  ;;  %s319_s26 = int_to_ptr.hbm [resolvable:$true] %s318_s26 }
  0x17   : > { %2939 = dma.hbm_to_vmem [thread:$0]  (!%p3640_p6), %s293_s19, 2048, %s295_s23, [#allocation6], %s3535_s30, %s3535_s30, %s3536_s11  }
  0x18   : > { %2945 = dma.hbm_to_vmem [thread:$0]  (!%p3640_p6), %s319_s26, 2048, %s321_s29, [#allocation9], %s4129_s12, %s4129_s12, %s4130_s17  }
  0x19   : > { %s3539_s25 = smov [#allocation7]   ;;  %s4140_s5 = sld [smem:[#allocation22_spill]] }
  0x1a   : > { %s309_s28 = sshll.u32 %s3539_s25, 4  ;;  %s3540_s26 = smov [#allocation10]   ;;  %s310_s28 = int_to_ptr.vmem [resolvable:$true] %s309_s28 }
  0x1b   : > { %s337_s29 = sshll.u32 %s3540_s26, 4  ;;  %s352_s25 = sshll.u32 %s4125_s7, 4  ;;  %s338_s29 = int_to_ptr.vmem [resolvable:$true] %s337_s29  ;;  %s353_s25 = int_to_ptr.hbm [resolvable:$true] %s352_s25 }
  0x1c   : > { %s307_s24 = sshll.u32 %s4139_s2, 4  ;;  %s2389_s19 = sadd.s32 4294967294, %s3531_s16   ;;  %s308_s24 = int_to_ptr.hbm [resolvable:$true] %s307_s24 }
  0x1d   : > { %2942 = dma.hbm_to_vmem [thread:$0]  (!%p3640_p6), %s308_s24, 32, %s310_s28, [#allocation6]  }
  0x1e   : > { %s3541_s24 = smov [#allocation11]   ;;  %s3671_s23 = sadd.s32 1, %s3531_s16  }
  0x1f   : > { %s335_s1 = sshll.u32 %s4140_s5, 4  ;;  %s354_s28 = sshll.u32 %s3541_s24, 4  ;;  %s336_s1 = int_to_ptr.hbm [resolvable:$true] %s335_s1  ;;  %s355_s28 = int_to_ptr.vmem [resolvable:$true] %s354_s28 }
  0x20   : > { %2948 = dma.hbm_to_vmem [thread:$0]  (!%p3640_p6), %s336_s1, 2048, %s338_s29, [#allocation9], %s3535_s30, %s3535_s30, %s3536_s11  }
  0x21   : > { %2951 = dma.hbm_to_vmem [thread:$0]  (!%p3640_p6), %s353_s25, 2048, %s355_s28, [#allocation12], %s4129_s12, %s4129_s12, %s4130_s17  }
  0x22   : > { %s37_s26 = sadd.s32 1, %s3527_s15  ;;  %s34_s18 = ssub.s32 %s3531_s16, %s3671_s23 }
  0x23   : > { %p44_p7 = scmp.ne.s32.totalorder %s3527_s15, %s3523_s14  ;;  %p35_p8 = scmp.eq.s32.totalorder %s34_s18, 0 }
  0x24   : > { %p45_p9 = scmp.eq.s32.totalorder %s3531_s16, 0  ;;  %p50_p10 = scmp.ne.s32.totalorder %s3523_s14, %s3519_s13 }
  0x25   : > { %p242_p11 = scmp.eq.s32.totalorder %s3623_s20, 1  ;;  %p248_p0 = scmp.eq.s32.totalorder %s2389_s19, 1 }
  0x26   : > { %s3683_s1 = scalar_select %p35_p8, %s3527_s15, %s37_s26  }
  0x27   : > { %p3687_p12 = por %p51_p1, %p50_p10  ;;  %p3691_p13 = por %p242_p11, %p44_p7 }
  0x28   : > { %p46_p2 = por %p45_p9, %p44_p7  ;;  %s371_s11 = sand.u32 1, %s3527_s15  }
  0x29   : > { %p3696_p4 = por %p248_p0, %p50_p10  ;;  %p2965_p6 = scmp.lt.s32.totalorder %s3531_s16, 2 }
  0x2a   : > { %s2397_s22 = sshll.u32 %s371_s11, 7  ;;  %s2735_s25 = sshll.u32 %s3531_s16, 7 }
  0x2b   : > { %s380_s26 = scalar_lea.hbm %s4118_s0, %s2735_s25  ;;  %s375_s12 = scalar_lea.vmem [#allocation2], %s2397_s22 }
  0x2c   : > { %s381_s18 = sshll.u32 %s380_s26, 4  ;;  %s383_s17 = sshll.u32 %s375_s12, 4  ;;  %s382_s18 = int_to_ptr.hbm [resolvable:$true] %s381_s18  ;;  %s384_s17 = int_to_ptr.vmem [resolvable:$true] %s383_s17 }
  0x2d   : > { %p3705_p8 = pnand %p2965_p6, %p46_p2  ;;  %s372_s2 = scalar_lea.sflag [#allocation3], %s371_s11 }
  0x2e   : > { %s3423_s3 = sshra.s32 %s382_s18, 4  ;;  %s3430_s12 = scalar_lea.hbm %s4118_s0, 256  ;;  %s3424_s3 = int_to_ptr.hbm [resolvable:$true] %s3423_s3 }
  0x2f   : > { %s3425_s5 = scalar_lea.hbm %s3424_s3, 128  ;;  %p3427_p9 = pneg %p3705_p8 }
  0x30   : > { %p3426_p7 = scmp.ne.s32.totalorder %s3424_s3, %s3425_s5  ;;  %p3431_p0 = scmp.lt.s32.totalorder %s3424_s3, %s4118_s0 }
  0x31   : > { %p3432_p2 = scmp.lt.s32.totalorder %s3430_s12, %s3425_s5 }
  0x32   : > { %p3428_p10 = pnand %p3427_p9, %p3426_p7 }
  0x33   : > { %p3433_p6 = por %p3432_p2, %p3431_p0 }
  0x34   : > { %p3429_p11 = pneg %p3428_p10 }
  0x36   : > { %p3434_p5 = pnand %p3433_p6, %p3429_p11 }
  0x38   : > { %3437 = shalt.err (!%p3434_p5)
}
  0x39   : > { %s4145_s11 = smov 4   ;;  %s4146_s26 = smov 64  }
  0x3a   : > { %2955 = dma.hbm_to_vmem [thread:$0]  (!%p3705_p8), %s382_s18, 2048, %s384_s17, %s372_s2, %s4146_s26, %s4146_s26, %s4145_s11  }
  0x3b   : > { %395 = sbr.rel (%p3628_p3) target bundleno = 1044 (0x414), region = 56  ;;  %s3725_s25 = sand.u32 (!%p3628_p3), 1, %s3523_s14  }
  0x3c   : > { %s2401_s3 = sshll.u32 (!%p3628_p3), %s3725_s25, 7  ;;  %s398_s5 = scalar_lea.sflag (!%p3628_p3), [#allocation3], %s3725_s25 }
  0x3d   : > { %s3731_s24 = scalar_lea.vmem (!%p3628_p3), [#allocation2], %s2401_s3 }
  0x40   : > { %3498 = dma.done.wait (%p3687_p12), %s398_s5, 2048  }
  0x41   : > { %3500 = vsyncadd (%p3687_p12), %s398_s5, 4294965248 }
  0x42   : > { %3502 = dma.done.wait (%p51_p1), [#allocation6], 2080  }
  0x43   : > { %3504 = vsyncadd (%p51_p1), [#allocation6], 4294965216 }
  0x44   : > { %3506 = dma.done.wait (%p51_p1), [#allocation9], 4096  }
  0x45   : > { %3508 = vsyncadd (%p51_p1), [#allocation9], 4294963200 }
  0x46   : > { %3510 = dma.done.wait (%p51_p1), [#allocation12], 2048  }
  0x47   : > { %3512 = vsyncadd (%p51_p1), [#allocation12], 4294965248  ;;  %v2532_v0 = vld [vmem:[#allocation5 + $0x70] sm:$0xf]  ;;  %v2767_v1 = vld [vmem:[#allocation5 + $0x74] sm:$0xf0] }
  0x48   : > { %v2766_v2 = vld [vmem:[#allocation5 + $0x74] sm:$0xf]  ;;  %v2533_v3 = vor.u32 %v2767_v1, %v2532_v0  ;;  %v2534_v4 = vld [vmem:[#allocation5 + $0x78] sm:$0xf0]  ;;  %v2524_v5 = vld [vmem:[#allocation5 + $0x60] sm:$0xf] }
  0x49   : > { %v2765_v6 = vld [vmem:[#allocation5 + $0x64] sm:$0xf0]  ;;  %v2537_v7 = vor.u32 %v2766_v2, %v2534_v4  ;;  %v2764_v8 = vld [vmem:[#allocation5 + $0x64] sm:$0xf]  ;;  %v2526_v9 = vld [vmem:[#allocation5 + $0x68] sm:$0xf0] }
  0x4a   : > { %707 = vmatpush.bf16.msra.mxu0 %v2533_v3  ;;  %v2525_v10 = vor.u32 %v2765_v6, %v2524_v5  ;;  %v2529_v11 = vor.u32 %v2764_v8, %v2526_v9  ;;  %v2516_v12 = vld [vmem:[#allocation5 + $0x50] sm:$0xf]  ;;  %v2763_v13 = vld [vmem:[#allocation5 + $0x54] sm:$0xf0]  ;;  %v2762_v14 = vld [vmem:[#allocation5 + $0x54] sm:$0xf] }
  0x4b   : > { %796 = vmatpush.bf16.msra.mxu1 %v2537_v7  ;;  %v2518_v15 = vld [vmem:[#allocation5 + $0x58] sm:$0xf0]  ;;  %v2517_v16 = vor.u32 %v2763_v13, %v2516_v12  ;;  %v2508_v18 = vld [vmem:[#allocation5 + $0x40] sm:$0xf]  ;;  %v2761_v19 = vld [vmem:[#allocation5 + $0x44] sm:$0xf0] }
  0x4c   : > { %v2521_v17 = vor.u32 %v2762_v14, %v2518_v15  ;;  %v2760_v20 = vld [vmem:[#allocation5 + $0x44] sm:$0xf]  ;;  %v2510_v21 = vld [vmem:[#allocation5 + $0x48] sm:$0xf0]  ;;  %v2509_v22 = vor.u32 %v2761_v19, %v2508_v18  ;;  %v2500_v24 = vld [vmem:[#allocation5 + $0x30] sm:$0xf] }
  0x4d   : > { %v2513_v23 = vor.u32 %v2760_v20, %v2510_v21  ;;  %v2759_v25 = vld [vmem:[#allocation5 + $0x34] sm:$0xf0]  ;;  %v2758_v26 = vld [vmem:[#allocation5 + $0x34] sm:$0xf]  ;;  %v2502_v27 = vld [vmem:[#allocation5 + $0x38] sm:$0xf0] }
  0x4e   : > { %708 = vmatpush.bf16.msra.mxu0 %v2525_v10  ;;  %v2501_v28 = vor.u32 %v2759_v25, %v2500_v24  ;;  %v2505_v29 = vor.u32 %v2758_v26, %v2502_v27  ;;  %v2492_v30 = vld [vmem:[#allocation5 + $0x20] sm:$0xf]  ;;  %v2757_v31 = vld [vmem:[#allocation5 + $0x24] sm:$0xf0]  ;;  %v2756_v32 = vld [vmem:[#allocation5 + $0x24] sm:$0xf] }
  0x4f   : > { %797 = vmatpush.bf16.msra.mxu1 %v2529_v11  ;;  %v2494_v33 = vld [vmem:[#allocation5 + $0x28] sm:$0xf0]  ;;  %v2493_v34 = vor.u32 %v2757_v31, %v2492_v30  ;;  %v2484_v36 = vld [vmem:[#allocation5 + $0x10] sm:$0xf]  ;;  %v2755_v37 = vld [vmem:[#allocation5 + $0x14] sm:$0xf0] }
  0x50   : > { %v2497_v35 = vor.u32 %v2756_v32, %v2494_v33  ;;  %v2754_v38 = vld [vmem:[#allocation5 + $0x14] sm:$0xf]  ;;  %v2486_v39 = vld [vmem:[#allocation5 + $0x18] sm:$0xf0]  ;;  %v2485_v40 = vor.u32 %v2755_v37, %v2484_v36  ;;  %v2476_v42 = vld [vmem:[#allocation5] sm:$0xf] }
  0x51   : > { %v2489_v41 = vor.u32 %v2754_v38, %v2486_v39  ;;  %v2753_v43 = vld [vmem:[#allocation5 + $0x4] sm:$0xf0]  ;;  %v2752_v44 = vld [vmem:[#allocation5 + $0x4] sm:$0xf]  ;;  %v2478_v45 = vld [vmem:[#allocation5 + $0x8] sm:$0xf0] }
  0x52   : > { %709 = vmatpush.bf16.msra.mxu0 %v2517_v16  ;;  %v2477_v46 = vor.u32 %v2753_v43, %v2476_v42  ;;  %v2481_v47 = vor.u32 %v2752_v44, %v2478_v45  ;;  %v2736_v48 = vld [vmem:[%s3731_s24] sm:$0xff]  ;;  %v2660_v49 = vld [vmem:[#allocation10 + $0x70] sm:$0xf]  ;;  %v2799_v50 = vld [vmem:[#allocation10 + $0x74] sm:$0xf0]  ;;  %s3929_s12 = scalar_lea.vmem [#allocation13], %s2401_s3 }
  0x53   : > { %798 = vmatpush.bf16.msra.mxu1 %v2521_v17  ;;  %v2798_v51 = vld [vmem:[#allocation10 + $0x74] sm:$0xf]  ;;  %v2661_v52 = vor.u32 %v2799_v50, %v2660_v49  ;;  %v2662_v53 = vld [vmem:[#allocation10 + $0x78] sm:$0xf0]  ;;  %v2737_v55 = vld [vmem:[%s3731_s24 + $0x8] sm:$0xff]  ;;  %s2408_s22 = sshll.u32 %s3623_s20, 5 }
  0x54   : > { %v2665_v54 = vor.u32 %v2798_v51, %v2662_v53  ;;  %v2738_v56 = vld [vmem:[%s3731_s24 + $0x10] sm:$0xff]  ;;  %v2652_v57 = vld [vmem:[#allocation10 + $0x60] sm:$0xf]  ;;  %v2797_v58 = vld [vmem:[#allocation10 + $0x64] sm:$0xf0]  ;;  %p472_p1 = scmp.lt.s32.totalorder %s2408_s22, 63 }
  0x55   : > { %v2796_v59 = vld [vmem:[#allocation10 + $0x64] sm:$0xf]  ;;  %v2653_v60 = vor.u32 %v2797_v58, %v2652_v57  ;;  %v2654_v61 = vld [vmem:[#allocation10 + $0x68] sm:$0xf0]  ;;  %v2739_v63 = vld [vmem:[%s3731_s24 + $0x18] sm:$0xff]  ;;  %vm2185_vm0 = vcmask 7168  }
  0x56   : > { %710 = vmatpush.bf16.msra.mxu0 %v2509_v22  ;;  %v2657_v62 = vor.u32 %v2796_v59, %v2654_v61  ;;  %v2740_v0 = vld [vmem:[%s3731_s24 + $0x20] sm:$0xff]  ;;  %v2644_v1 = vld [vmem:[#allocation10 + $0x50] sm:$0xf]  ;;  %v2795_v2 = vld [vmem:[#allocation10 + $0x54] sm:$0xf0]  ;;  %s4153_s22 = smov (!%p472_p1, %s2408_s22), 63 }
  0x57   : > { %799 = vmatpush.bf16.msra.mxu1 %v2513_v23  ;;  %v2794_v3 = vld [vmem:[#allocation10 + $0x54] sm:$0xf]  ;;  %v2645_v4 = vor.u32 %v2795_v2, %v2644_v1  ;;  %v2646_v5 = vld [vmem:[#allocation10 + $0x58] sm:$0xf0]  ;;  %v2741_v7 = vld [vmem:[%s3731_s24 + $0x28] sm:$0xff]  ;;  %s2409_s28 = sshll.u32 %s4153_s22, 3 }
  0x58   : > { %v2649_v6 = vor.u32 %v2794_v3, %v2646_v5  ;;  %v2775_v8 = vld [vmem:[#allocation8 + $0x38] sm:$0xff]  ;;  %v2774_v10 = vld [vmem:[#allocation8 + $0x30] sm:$0xff]  ;;  %v2773_v12 = vld [vmem:[#allocation8 + $0x28] sm:$0xff]  ;;  %s3984_s3 = scalar_lea.vmem %s4128_s10, %s2409_s28  ;;  %s2816_s5 = sshll.u32 %s3623_s20, 7 }
  0x59   : > { %v2783_v9 = vld [vmem:[#allocation8 + $0x78] sm:$0xff]  ;;  %1113 = vmatpush.bf16.msra.mxu2 %v2775_v8  ;;  %v2782_v11 = vld [vmem:[#allocation8 + $0x70] sm:$0xff]  ;;  %v2781_v13 = vld [vmem:[#allocation8 + $0x68] sm:$0xff]  ;;  %s2236_s17 = sshll.u32 %s3929_s12, 4  ;;  %s2219_s20 = scalar_lea.sflag [#allocation4], %s3725_s25  ;;  %s2237_s17 = int_to_ptr.vmem [resolvable:$true] %s2236_s17 }
  0x5a   : > { %711 = vmatpush.bf16.msra.mxu0 %v2501_v28  ;;  %1202 = vmatpush.bf16.msra.mxu3 %v2783_v9  ;;  %v2742_v14 = vld [vmem:[%s3731_s24 + $0x30] sm:$0xff]  ;;  %v2772_v15 = vld [vmem:[#allocation8 + $0x20] sm:$0xff]  ;;  %v2771_v17 = vld [vmem:[#allocation8 + $0x18] sm:$0xff]  ;;  %s3473_s11 = scalar_lea.hbm %s4127_s9, 256 }
  0x5b   : > { %800 = vmatpush.bf16.msra.mxu1 %v2505_v29  ;;  %v2780_v16 = vld [vmem:[#allocation8 + $0x60] sm:$0xff]  ;;  %v2779_v18 = vld [vmem:[#allocation8 + $0x58] sm:$0xff]  ;;  %v2793_v20 = vld [vmem:[#allocation10 + $0x44] sm:$0xf0] }
  0x5c   : > { %v2636_v19 = vld [vmem:[#allocation10 + $0x40] sm:$0xf]  ;;  %v2770_v22 = vld [vmem:[#allocation8 + $0x10] sm:$0xff]  ;;  %v2792_v24 = vld [vmem:[#allocation10 + $0x44] sm:$0xf] }
  0x5d   : > { %1114 = vmatpush.bf16.msra.mxu2 %v2774_v10  ;;  %v2637_v21 = vor.u32 %v2793_v20, %v2636_v19  ;;  %v2778_v23 = vld [vmem:[#allocation8 + $0x50] sm:$0xff]  ;;  %v2638_v25 = vld [vmem:[#allocation10 + $0x48] sm:$0xf0]  ;;  %v2768_v30 = vld [vmem:[#allocation8] sm:$0xff] }
  0x5e   : > { %712 = vmatpush.bf16.msra.mxu0 %v2493_v34  ;;  %1203 = vmatpush.bf16.msra.mxu3 %v2782_v11  ;;  %v2769_v26 = vld [vmem:[#allocation8 + $0x8] sm:$0xff]  ;;  %v2641_v27 = vor.u32 %v2792_v24, %v2638_v25  ;;  %v2743_v29 = vld [vmem:[%s3731_s24 + $0x38] sm:$0xff]  ;;  %v2776_v31 = vld [vmem:[#allocation8 + $0x40] sm:$0xff] }
  0x5f   : > { %801 = vmatpush.bf16.msra.mxu1 %v2497_v35  ;;  %v2777_v28 = vld [vmem:[#allocation8 + $0x48] sm:$0xff]  ;;  %v525_v32 = vld [vmem:[#allocation7] sm:$0x3]  ;;  %v2628_v39 = vld [vmem:[#allocation10 + $0x30] sm:$0xf] }
  0x60   : > { %v2744_v33 = vld [vmem:[%s3731_s24 + $0x40] sm:$0xff]  ;;  %v3758_v35 = vperm.slane %v525_v32, 0  ;;  %v3760_v37 = vperm.slane %v525_v32, 1  ;;  %v2745_v51 = vld [vmem:[%s3731_s24 + $0x48] sm:$0xff]  ;;  %v2747_v25 = vld [vmem:[%s3731_s24 + $0x58] sm:$0xff] }
  0x61   : > { %1115 = vmatpush.bf16.msra.mxu2 %v2773_v12  ;;  %v2815_v2 = vld [vmem:[#allocation11 + $0x78] sm:$0xff] }
  0x62   : > { %713 = vmatpush.bf16.msra.mxu0 %v2485_v40  ;;  %1204 = vmatpush.bf16.msra.mxu3 %v2781_v13  ;;  %v2791_v40 = vld [vmem:[#allocation10 + $0x34] sm:$0xf0]  ;;  %v2620_v13 = vld [vmem:[#allocation10 + $0x20] sm:$0xf] }
  0x63   : > { %802 = vmatpush.bf16.msra.mxu1 %v2489_v41  ;;  %v2629_v42 = vor.u32 %v2791_v40, %v2628_v39 }
  0x65   : > { %1116 = vmatpush.bf16.msra.mxu2 %v2772_v15 }
  0x66   : > { %714 = vmatpush.bf16.msra.mxu0 %v2477_v46  ;;  %1205 = vmatpush.bf16.msra.mxu3 %v2780_v16 }
  0x67   : > { %803 = vmatpush.bf16.msra.mxu1 %v2481_v47  ;;  %v2790_v47 = vld [vmem:[#allocation10 + $0x34] sm:$0xf] }
  0x69   : > { %715 = vmatmul.bf16.vlgmr.msra.gmra.mxu0 %v2736_v48  ;;  %1117 = vmatpush.bf16.msra.mxu2 %v2771_v17 }
  0x6a   : > { %804 = vmatmul.bf16.vlgmr.msra.gmra.mxu1 %v2736_v48  ;;  %1409 = vmatpush.bf16.msrb.mxu0 %v2661_v52  ;;  %v2630_v48 = vld [vmem:[#allocation10 + $0x38] sm:$0xf0] }
  0x6b   : > { %1498 = vmatpush.bf16.msrb.mxu1 %v2665_v54  ;;  %1206 = vmatpush.bf16.msra.mxu3 %v2779_v18  ;;  %v2633_v49 = vor.u32 %v2790_v47, %v2630_v48 }
  0x6d   : > { %1118 = vmatpush.bf16.msra.mxu2 %v2770_v22  ;;  %v2622_v22 = vld [vmem:[#allocation10 + $0x28] sm:$0xf0] }
  0x6e   : > { %1410 = vmatpush.bf16.msrb.mxu0 %v2653_v60  ;;  %v2807_v60 = vld [vmem:[#allocation11 + $0x38] sm:$0xff] }
  0x6f   : > { %1499 = vmatpush.bf16.msrb.mxu1 %v2657_v62  ;;  %1207 = vmatpush.bf16.msra.mxu3 %v2778_v23 }
  0x71   : > { %1119 = vmatpush.bf16.msra.mxu2 %v2769_v26 }
  0x72   : > { %1411 = vmatpush.bf16.msrb.mxu0 %v2645_v4  ;;  %v2746_v4 = vld [vmem:[%s3731_s24 + $0x50] sm:$0xff] }
  0x73   : > { %1500 = vmatpush.bf16.msrb.mxu1 %v2649_v6  ;;  %1208 = vmatpush.bf16.msra.mxu3 %v2777_v28 }
  0x75   : > { %1120 = vmatpush.bf16.msra.mxu2 %v2768_v30 }
  0x76   : > { %1412 = vmatpush.bf16.msrb.mxu0 %v2637_v21  ;;  %v2788_v21 = vld [vmem:[#allocation10 + $0x24] sm:$0xf] }
  0x77   : > { %1501 = vmatpush.bf16.msrb.mxu1 %v2641_v27  ;;  %1209 = vmatpush.bf16.msra.mxu3 %v2776_v31  ;;  %v2625_v23 = vor.u32 %v2788_v21, %v2622_v22 }
  0x79   : > { %720 = vmatmul.bf16.gmra.mxu0 %v2737_v55  ;;  %1815 = vmatpush.bf16.msrb.mxu2 %v2807_v60 }
  0x7a   : > { %809 = vmatmul.bf16.gmra.mxu1 %v2737_v55  ;;  %1413 = vmatpush.bf16.msrb.mxu0 %v2629_v42  ;;  %v2814_v42 = vld [vmem:[#allocation11 + $0x70] sm:$0xff] }
  0x7b   : > { %1502 = vmatpush.bf16.msrb.mxu1 %v2633_v49  ;;  %1904 = vmatpush.bf16.msrb.mxu3 %v2815_v2 }
  0x7f   : > { %1503 = vmatpush.bf16.msrb.mxu1 %v2625_v23  ;;  %1905 = vmatpush.bf16.msrb.mxu3 %v2814_v42 }
  0x89   : > { %725 = vmatmul.bf16.gmra.mxu0 %v2738_v56 }
  0x8a   : > { %814 = vmatmul.bf16.gmra.mxu1 %v2738_v56 }
  0x99   : > { %730 = vmatmul.bf16.gmra.mxu0 %v2739_v63 }
  0x9a   : > { %819 = vmatmul.bf16.gmra.mxu1 %v2739_v63 }
  0xa9   : > { %735 = vmatmul.bf16.gmra.mxu0 %v2740_v0 }
  0xaa   : > { %824 = vmatmul.bf16.gmra.mxu1 %v2740_v0 }
  0xb9   : > { %740 = vmatmul.bf16.gmra.mxu0 %v2741_v7 }
  0xba   : > { %829 = vmatmul.bf16.gmra.mxu1 %v2741_v7 }
  0xc9   : > { %745 = vmatmul.bf16.gmra.mxu0 %v2742_v14 }
  0xca   : > { %834 = vmatmul.bf16.gmra.mxu1 %v2742_v14  ;;  %v2789_v14 = vld [vmem:[#allocation10 + $0x24] sm:$0xf0] }
  0xcb   : > { %v2621_v16 = vor.u32 %v2789_v14, %v2620_v13 }
  0xcd   : > { %1414 = vmatpush.bf16.msrb.mxu0 %v2621_v16  ;;  %v2813_v16 = vld [vmem:[#allocation11 + $0x68] sm:$0xff] }
  0xce   : > { %1906 = vmatpush.bf16.msrb.mxu3 %v2813_v16 }
  0xd9   : > { %750 = vmatmul.bf16.gmra.mxu0 %v2743_v29 }
  0xda   : > { %839 = vmatmul.bf16.gmra.mxu1 %v2743_v29 }
  0xe6   : > { %v716_v34 = vpop.f32.mrf.mxu0 }
  0xe7   : > { %v805_v36 = vpop.f32.mrf.mxu1  ;;  %v717_v38 = vadd.f32 %v716_v34, %v3758_v35  ;;  %v2806_v34 = vld [vmem:[#allocation11 + $0x30] sm:$0xff] }
  0xe8   : > { %v806_v41 = vadd.f32 %v805_v36, %v3760_v37  ;;  %1816 = vmatpush.bf16.msrb.mxu2 %v2806_v34 }
  0xe9   : > { %755 = vmatmul.bf16.gmra.mxu0 %v2744_v33  ;;  %3017 = vtanh.f32 %v717_v38 }
  0xea   : > { %844 = vmatmul.bf16.gmra.mxu1 %v2744_v33  ;;  %3019 = vtanh.f32 %v806_v41 }
  0xee   : > { %v718_v43 = vpop.f32.mrf.mxu0 }
  0xef   : > { %v719_v44 = vadd.f32 %v718_v43, %v3758_v35  ;;  %v807_v45 = vpop.f32.mrf.mxu1  ;;  %v3018_v50 = vpop.eup %3017 }
  0xf0   : > { %v808_v46 = vadd.f32 %v807_v45, %v3760_v37  ;;  %v3020_v52 = vpop.eup %3019 }
  0xf1   : > { %3021 = vtanh.f32 %v719_v44  ;;  %v2748_v44 = vld [vmem:[%s3731_s24 + $0x60] sm:$0xff] }
  0xf2   : > { %3023 = vtanh.f32 %v808_v46 }
  0xf6   : > { %v721_v53 = vpop.f32.mrf.mxu0 }
  0xf7   : > { %v3022_v54 = vpop.eup %3021  ;;  %v810_v55 = vpop.f32.mrf.mxu1  ;;  %v722_v59 = vadd.f32 %v721_v53, %v3758_v35  ;;  %v2612_v53 = vld [vmem:[#allocation10 + $0x10] sm:$0xf] }
  0xf8   : > { %v3024_v56 = vpop.eup %3023  ;;  %v949_v57 = vpack.c.bf16 %v3022_v54, %v3018_v50  ;;  %v811_v61 = vadd.f32 %v810_v55, %v3760_v37  ;;  %v2787_v54 = vld [vmem:[#allocation10 + $0x14] sm:$0xf0] }
  0xf9   : > { %760 = vmatmul.bf16.gmra.mxu0 %v2745_v51  ;;  %v950_v58 = vpack.c.bf16 %v3024_v56, %v3020_v52  ;;  %3025 = vtanh.f32 %v722_v59  ;;  %v2613_v56 = vor.u32 %v2787_v54, %v2612_v53 }
  0xfa   : > { %849 = vmatmul.bf16.gmra.mxu1 %v2745_v51  ;;  %1121 = vmatmul.bf16.vlgmr.msra.gmra.mxu2 %v949_v57  ;;  %3027 = vtanh.f32 %v811_v61  ;;  %v2786_v61 = vld [vmem:[#allocation10 + $0x14] sm:$0xf] }
  0xfb   : > { %1210 = vmatmul.bf16.vlgmr.msra.gmra.mxu3 %v950_v58  ;;  %1415 = vmatpush.bf16.msrb.mxu0 %v2613_v56  ;;  %v2812_v56 = vld [vmem:[#allocation11 + $0x60] sm:$0xff] }
  0xfc   : > { %1907 = vmatpush.bf16.msrb.mxu3 %v2812_v56 }
  0xfe   : > { %v723_v62 = vpop.f32.mrf.mxu0 }
  0xff   : > { %v724_v63 = vadd.f32 %v723_v62, %v3758_v35  ;;  %v812_v0 = vpop.f32.mrf.mxu1  ;;  %v3026_v3 = vpop.eup %3025  ;;  %v2614_v62 = vld [vmem:[#allocation10 + $0x18] sm:$0xf0] }
 0x100   : > { %v813_v1 = vadd.f32 %v812_v0, %v3760_v37  ;;  %v3028_v5 = vpop.eup %3027 }
 0x101   : > { %3029 = vtanh.f32 %v724_v63  ;;  %v2617_v63 = vor.u32 %v2786_v61, %v2614_v62 }
 0x102   : > { %3031 = vtanh.f32 %v813_v1  ;;  %v2749_v1 = vld [vmem:[%s3731_s24 + $0x68] sm:$0xff] }
 0x103   : > { %1504 = vmatpush.bf16.msrb.mxu1 %v2617_v63 }
 0x106   : > { %v726_v6 = vpop.f32.mrf.mxu0 }
 0x107   : > { %v3030_v7 = vpop.eup %3029  ;;  %v815_v8 = vpop.f32.mrf.mxu1  ;;  %v727_v12 = vadd.f32 %v726_v6, %v3758_v35 }
 0x108   : > { %v3032_v9 = vpop.eup %3031  ;;  %v951_v10 = vpack.c.bf16 %v3030_v7, %v3026_v3  ;;  %v816_v15 = vadd.f32 %v815_v8, %v3760_v37 }
 0x109   : > { %765 = vmatmul.bf16.gmra.mxu0 %v2746_v4  ;;  %v952_v11 = vpack.c.bf16 %v3032_v9, %v3028_v5  ;;  %3033 = vtanh.f32 %v727_v12 }
 0x10a   : > { %854 = vmatmul.bf16.gmra.mxu1 %v2746_v4  ;;  %1126 = vmatmul.bf16.gmra.mxu2 %v951_v10  ;;  %3035 = vtanh.f32 %v816_v15  ;;  %v2805_v10 = vld [vmem:[#allocation11 + $0x28] sm:$0xff] }
 0x10b   : > { %1215 = vmatmul.bf16.gmra.mxu3 %v952_v11  ;;  %1817 = vmatpush.bf16.msrb.mxu2 %v2805_v10 }
 0x10e   : > { %v728_v17 = vpop.f32.mrf.mxu0 }
 0x10f   : > { %v729_v18 = vadd.f32 %v728_v17, %v3758_v35  ;;  %v817_v19 = vpop.f32.mrf.mxu1  ;;  %v3034_v24 = vpop.eup %3033 }
 0x110   : > { %v818_v20 = vadd.f32 %v817_v19, %v3760_v37  ;;  %v3036_v26 = vpop.eup %3035 }
 0x111   : > { %3037 = vtanh.f32 %v729_v18  ;;  %v2750_v18 = vld [vmem:[%s3731_s24 + $0x70] sm:$0xff] }
 0x112   : > { %3039 = vtanh.f32 %v818_v20 }
 0x116   : > { %v731_v27 = vpop.f32.mrf.mxu0 }
 0x117   : > { %v3038_v28 = vpop.eup %3037  ;;  %v820_v29 = vpop.f32.mrf.mxu1  ;;  %v732_v33 = vadd.f32 %v731_v27, %v3758_v35  ;;  %v2604_v27 = vld [vmem:[#allocation10] sm:$0xf] }
 0x118   : > { %v3040_v30 = vpop.eup %3039  ;;  %v953_v31 = vpack.c.bf16 %v3038_v28, %v3034_v24  ;;  %v821_v36 = vadd.f32 %v820_v29, %v3760_v37  ;;  %v2785_v28 = vld [vmem:[#allocation10 + $0x4] sm:$0xf0] }
 0x119   : > { %770 = vmatmul.bf16.gmra.mxu0 %v2747_v25  ;;  %v954_v32 = vpack.c.bf16 %v3040_v30, %v3036_v26  ;;  %3041 = vtanh.f32 %v732_v33  ;;  %v2605_v30 = vor.u32 %v2785_v28, %v2604_v27 }
 0x11a   : > { %859 = vmatmul.bf16.gmra.mxu1 %v2747_v25  ;;  %1131 = vmatmul.bf16.gmra.mxu2 %v953_v31  ;;  %3043 = vtanh.f32 %v821_v36  ;;  %v2784_v36 = vld [vmem:[#allocation10 + $0x4] sm:$0xf] }
 0x11b   : > { %1220 = vmatmul.bf16.gmra.mxu3 %v954_v32  ;;  %1416 = vmatpush.bf16.msrb.mxu0 %v2605_v30 }
 0x11e   : > { %v733_v38 = vpop.f32.mrf.mxu0 }
 0x11f   : > { %v734_v39 = vadd.f32 %v733_v38, %v3758_v35  ;;  %v822_v40 = vpop.f32.mrf.mxu1  ;;  %v3042_v43 = vpop.eup %3041  ;;  %v2606_v38 = vld [vmem:[#allocation10 + $0x8] sm:$0xf0] }
 0x120   : > { %v823_v41 = vadd.f32 %v822_v40, %v3760_v37  ;;  %v3044_v45 = vpop.eup %3043 }
 0x121   : > { %3045 = vtanh.f32 %v734_v39  ;;  %v2609_v39 = vor.u32 %v2784_v36, %v2606_v38 }
 0x122   : > { %3047 = vtanh.f32 %v823_v41  ;;  %v2751_v41 = vld [vmem:[%s3731_s24 + $0x78] sm:$0xff] }
 0x123   : > { %1505 = vmatpush.bf16.msrb.mxu1 %v2609_v39 }
 0x126   : > { %v736_v46 = vpop.f32.mrf.mxu0 }
 0x127   : > { %v3046_v47 = vpop.eup %3045  ;;  %v825_v48 = vpop.f32.mrf.mxu1  ;;  %v737_v52 = vadd.f32 %v736_v46, %v3758_v35 }
 0x128   : > { %v3048_v49 = vpop.eup %3047  ;;  %v955_v50 = vpack.c.bf16 %v3046_v47, %v3042_v43  ;;  %v826_v55 = vadd.f32 %v825_v48, %v3760_v37 }
 0x129   : > { %775 = vmatmul.bf16.gmra.mxu0 %v2748_v44  ;;  %v956_v51 = vpack.c.bf16 %v3048_v49, %v3044_v45  ;;  %3049 = vtanh.f32 %v737_v52 }
 0x12a   : > { %864 = vmatmul.bf16.gmra.mxu1 %v2748_v44  ;;  %1136 = vmatmul.bf16.gmra.mxu2 %v955_v50  ;;  %3051 = vtanh.f32 %v826_v55  ;;  %v2804_v55 = vld [vmem:[#allocation11 + $0x20] sm:$0xff] }
 0x12b   : > { %1225 = vmatmul.bf16.gmra.mxu3 %v956_v51  ;;  %1818 = vmatpush.bf16.msrb.mxu2 %v2804_v55 }
 0x12e   : > { %v738_v57 = vpop.f32.mrf.mxu0 }
 0x12f   : > { %v739_v58 = vadd.f32 %v738_v57, %v3758_v35  ;;  %v827_v59 = vpop.f32.mrf.mxu1  ;;  %v3050_v0 = vpop.eup %3049 }
 0x130   : > { %v828_v60 = vadd.f32 %v827_v59, %v3760_v37  ;;  %v3052_v2 = vpop.eup %3051 }
 0x131   : > { %3053 = vtanh.f32 %v739_v58 }
 0x132   : > { %3055 = vtanh.f32 %v828_v60 }
 0x136   : > { %v741_v3 = vpop.f32.mrf.mxu0 }
 0x137   : > { %v3054_v4 = vpop.eup %3053  ;;  %v830_v5 = vpop.f32.mrf.mxu1  ;;  %v742_v9 = vadd.f32 %v741_v3, %v3758_v35 }
 0x138   : > { %v3056_v6 = vpop.eup %3055  ;;  %v957_v7 = vpack.c.bf16 %v3054_v4, %v3050_v0  ;;  %v831_v11 = vadd.f32 %v830_v5, %v3760_v37 }
 0x139   : > { %780 = vmatmul.bf16.gmra.mxu0 %v2749_v1  ;;  %v958_v8 = vpack.c.bf16 %v3056_v6, %v3052_v2  ;;  %3057 = vtanh.f32 %v742_v9 }
 0x13a   : > { %869 = vmatmul.bf16.gmra.mxu1 %v2749_v1  ;;  %1141 = vmatmul.bf16.gmra.mxu2 %v957_v7  ;;  %3059 = vtanh.f32 %v831_v11 }
 0x13b   : > { %1230 = vmatmul.bf16.gmra.mxu3 %v958_v8 }
 0x13e   : > { %v743_v12 = vpop.f32.mrf.mxu0 }
 0x13f   : > { %v744_v13 = vadd.f32 %v743_v12, %v3758_v35  ;;  %v832_v14 = vpop.f32.mrf.mxu1  ;;  %v3058_v17 = vpop.eup %3057 }
 0x140   : > { %v833_v15 = vadd.f32 %v832_v14, %v3760_v37  ;;  %v3060_v19 = vpop.eup %3059 }
 0x141   : > { %3061 = vtanh.f32 %v744_v13 }
 0x142   : > { %3063 = vtanh.f32 %v833_v15 }
 0x146   : > { %v746_v20 = vpop.f32.mrf.mxu0 }
 0x147   : > { %v3062_v21 = vpop.eup %3061  ;;  %v835_v22 = vpop.f32.mrf.mxu1  ;;  %v747_v26 = vadd.f32 %v746_v20, %v3758_v35 }
 0x148   : > { %v3064_v23 = vpop.eup %3063  ;;  %v959_v24 = vpack.c.bf16 %v3062_v21, %v3058_v17  ;;  %v836_v29 = vadd.f32 %v835_v22, %v3760_v37  ;;  %v3811_v22 = vld [vmem:[%s4122_s4] ss:$0 sm:$0xff] }
 0x149   : > { %785 = vmatmul.bf16.gmra.mxu0 %v2750_v18  ;;  %v960_v25 = vpack.c.bf16 %v3064_v23, %v3060_v19  ;;  %3065 = vtanh.f32 %v747_v26 }
 0x14a   : > { %874 = vmatmul.bf16.gmra.mxu1 %v2750_v18  ;;  %1146 = vmatmul.bf16.gmra.mxu2 %v959_v24  ;;  %3067 = vtanh.f32 %v836_v29  ;;  %v2803_v24 = vld [vmem:[#allocation11 + $0x18] sm:$0xff] }
 0x14b   : > { %1235 = vmatmul.bf16.gmra.mxu3 %v960_v25  ;;  %1819 = vmatpush.bf16.msrb.mxu2 %v2803_v24  ;;  %v2811_v25 = vld [vmem:[#allocation11 + $0x58] sm:$0xff] }
 0x14c   : > { %1908 = vmatpush.bf16.msrb.mxu3 %v2811_v25 }
 0x14e   : > { %v748_v31 = vpop.f32.mrf.mxu0 }
 0x14f   : > { %v749_v32 = vadd.f32 %v748_v31, %v3758_v35  ;;  %v837_v33 = vpop.f32.mrf.mxu1  ;;  %v3066_v40 = vpop.eup %3065 }
 0x150   : > { %v838_v34 = vadd.f32 %v837_v33, %v3760_v37  ;;  %v3068_v42 = vpop.eup %3067 }
 0x151   : > { %3069 = vtanh.f32 %v749_v32 }
 0x152   : > { %3071 = vtanh.f32 %v838_v34 }
 0x156   : > { %v751_v43 = vpop.f32.mrf.mxu0 }
 0x157   : > { %v3070_v44 = vpop.eup %3069  ;;  %v840_v45 = vpop.f32.mrf.mxu1  ;;  %v752_v49 = vadd.f32 %v751_v43, %v3758_v35 }
 0x158   : > { %v3072_v46 = vpop.eup %3071  ;;  %v961_v47 = vpack.c.bf16 %v3070_v44, %v3066_v40  ;;  %v841_v50 = vadd.f32 %v840_v45, %v3760_v37 }
 0x159   : > { %790 = vmatmul.bf16.gmra.mxu0 %v2751_v41  ;;  %v962_v48 = vpack.c.bf16 %v3072_v46, %v3068_v42  ;;  %3073 = vtanh.f32 %v752_v49 }
 0x15a   : > { %879 = vmatmul.bf16.gmra.mxu1 %v2751_v41  ;;  %1151 = vmatmul.bf16.gmra.mxu2 %v961_v47  ;;  %3075 = vtanh.f32 %v841_v50 }
 0x15b   : > { %1240 = vmatmul.bf16.gmra.mxu3 %v962_v48 }
 0x15e   : > { %v753_v51 = vpop.f32.mrf.mxu0 }
 0x15f   : > { %v754_v52 = vadd.f32 %v753_v51, %v3758_v35  ;;  %v842_v53 = vpop.f32.mrf.mxu1  ;;  %v3074_v57 = vpop.eup %3073 }
 0x160   : > { %v843_v54 = vadd.f32 %v842_v53, %v3760_v37  ;;  %v3076_v58 = vpop.eup %3075 }
 0x161   : > { %3077 = vtanh.f32 %v754_v52 }
 0x162   : > { %3079 = vtanh.f32 %v843_v54 }
 0x166   : > { %v756_v59 = vpop.f32.mrf.mxu0 }
 0x167   : > { %v3078_v60 = vpop.eup %3077  ;;  %v845_v61 = vpop.f32.mrf.mxu1  ;;  %v757_v1 = vadd.f32 %v756_v59, %v3758_v35 }
 0x168   : > { %v3080_v62 = vpop.eup %3079  ;;  %v963_v63 = vpack.c.bf16 %v3078_v60, %v3074_v57  ;;  %v846_v2 = vadd.f32 %v845_v61, %v3760_v37 }
 0x169   : > { %v964_v0 = vpack.c.bf16 %v3080_v62, %v3076_v58  ;;  %3081 = vtanh.f32 %v757_v1 }
 0x16a   : > { %1156 = vmatmul.bf16.gmra.mxu2 %v963_v63  ;;  %3083 = vtanh.f32 %v846_v2 }
 0x16b   : > { %1245 = vmatmul.bf16.gmra.mxu3 %v964_v0 }
 0x16e   : > { %v758_v3 = vpop.f32.mrf.mxu0 }
 0x16f   : > { %v759_v4 = vadd.f32 %v758_v3, %v3758_v35  ;;  %v847_v5 = vpop.f32.mrf.mxu1  ;;  %v3082_v7 = vpop.eup %3081 }
 0x170   : > { %v848_v6 = vadd.f32 %v847_v5, %v3760_v37  ;;  %v3084_v8 = vpop.eup %3083 }
 0x171   : > { %3085 = vtanh.f32 %v759_v4 }
 0x172   : > { %3087 = vtanh.f32 %v848_v6 }
 0x176   : > { %v761_v9 = vpop.f32.mrf.mxu0 }
 0x177   : > { %v3086_v10 = vpop.eup %3085  ;;  %v850_v11 = vpop.f32.mrf.mxu1  ;;  %v762_v15 = vadd.f32 %v761_v9, %v3758_v35 }
 0x178   : > { %v3088_v12 = vpop.eup %3087  ;;  %v965_v13 = vpack.c.bf16 %v3086_v10, %v3082_v7  ;;  %v851_v16 = vadd.f32 %v850_v11, %v3760_v37  ;;  %v2802_v10 = vld [vmem:[#allocation11 + $0x10] sm:$0xff] }
 0x179   : > { %v966_v14 = vpack.c.bf16 %v3088_v12, %v3084_v8  ;;  %3089 = vtanh.f32 %v762_v15  ;;  %1820 = vmatpush.bf16.msrb.mxu2 %v2802_v10  ;;  %v2810_v11 = vld [vmem:[#allocation11 + $0x50] sm:$0xff] }
 0x17a   : > { %1161 = vmatmul.bf16.gmra.mxu2 %v965_v13  ;;  %3091 = vtanh.f32 %v851_v16  ;;  %1909 = vmatpush.bf16.msrb.mxu3 %v2810_v11 }
 0x17b   : > { %1250 = vmatmul.bf16.gmra.mxu3 %v966_v14 }
 0x17d   : > { %v1122_v17 = vpop.f32.mrf.mxu2 }
 0x17e   : > { %v1211_v18 = vpop.f32.mrf.mxu3  ;;  %v763_v19 = vpop.f32.mrf.mxu0  ;;  %v1123_v26 = vadd.f32 %v3811_v22, %v1122_v17 }
 0x17f   : > { %v764_v20 = vadd.f32 %v763_v19, %v3758_v35  ;;  %v852_v21 = vpop.f32.mrf.mxu1  ;;  %v3090_v27 = vpop.eup %3089 }
 0x180   : > { %v853_v23 = vadd.f32 %v852_v21, %v3760_v37  ;;  %v3092_v29 = vpop.eup %3091  ;;  %v1212_v38 = vadd.f32 %v1211_v18, %v1123_v26 }
 0x181   : > { %3093 = vtanh.f32 %v764_v20 }
 0x182   : > { %3095 = vtanh.f32 %v853_v23 }
 0x185   : > { %v1124_v28 = vpop.f32.mrf.mxu2 }
 0x186   : > { %v1125_v30 = vadd.f32 %v3811_v22, %v1124_v28  ;;  %v1213_v31 = vpop.f32.mrf.mxu3  ;;  %v766_v32 = vpop.f32.mrf.mxu0 }
 0x187   : > { %v3094_v33 = vpop.eup %3093  ;;  %v855_v34 = vpop.f32.mrf.mxu1  ;;  %v767_v43 = vadd.f32 %v766_v32, %v3758_v35 }
 0x188   : > { %v3096_v36 = vpop.eup %3095  ;;  %v1214_v39 = vadd.f32 %v1213_v31, %v1125_v30  ;;  %v967_v40 = vpack.c.bf16 %v3094_v33, %v3090_v27  ;;  %v856_v44 = vadd.f32 %v855_v34, %v3760_v37 }
 0x189   : > { %v968_v41 = vpack.c.bf16 %v3096_v36, %v3092_v29  ;;  %3097 = vtanh.f32 %v767_v43 }
 0x18a   : > { %v1291_v42 = vpack.c.bf16 %v1214_v39, %v1212_v38  ;;  %1166 = vmatmul.bf16.gmra.mxu2 %v967_v40  ;;  %3099 = vtanh.f32 %v856_v44 }
 0x18b   : > { %1255 = vmatmul.bf16.gmra.mxu3 %v968_v41 }
 0x18c   : > { %1417 = vmatmul.bf16.vlgmr.msrb.gmra.mxu0 %v1291_v42  ;;  %1506 = vmatmul.bf16.vlgmr.msrb.gmra.mxu1 %v1291_v42 }
 0x18d   : > { %v1127_v45 = vpop.f32.mrf.mxu2 }
 0x18e   : > { %v1216_v46 = vpop.f32.mrf.mxu3  ;;  %v768_v47 = vpop.f32.mrf.mxu0  ;;  %v1128_v51 = vadd.f32 %v3811_v22, %v1127_v45 }
 0x18f   : > { %v769_v48 = vadd.f32 %v768_v47, %v3758_v35  ;;  %v857_v49 = vpop.f32.mrf.mxu1  ;;  %v3098_v52 = vpop.eup %3097 }
 0x190   : > { %v858_v50 = vadd.f32 %v857_v49, %v3760_v37  ;;  %v3100_v54 = vpop.eup %3099  ;;  %v1217_v61 = vadd.f32 %v1216_v46, %v1128_v51 }
 0x191   : > { %3101 = vtanh.f32 %v769_v48 }
 0x192   : > { %3103 = vtanh.f32 %v858_v50 }
 0x195   : > { %v1129_v53 = vpop.f32.mrf.mxu2 }
 0x196   : > { %v1130_v55 = vadd.f32 %v3811_v22, %v1129_v53  ;;  %v1218_v56 = vpop.f32.mrf.mxu3  ;;  %v771_v57 = vpop.f32.mrf.mxu0 }
 0x197   : > { %v3102_v58 = vpop.eup %3101  ;;  %v860_v59 = vpop.f32.mrf.mxu1  ;;  %v772_v2 = vadd.f32 %v771_v57, %v3758_v35 }
 0x198   : > { %v3104_v60 = vpop.eup %3103  ;;  %v1219_v62 = vadd.f32 %v1218_v56, %v1130_v55  ;;  %v969_v63 = vpack.c.bf16 %v3102_v58, %v3098_v52  ;;  %v861_v3 = vadd.f32 %v860_v59, %v3760_v37 }
 0x199   : > { %v970_v0 = vpack.c.bf16 %v3104_v60, %v3100_v54  ;;  %3105 = vtanh.f32 %v772_v2 }
 0x19a   : > { %v1292_v1 = vpack.c.bf16 %v1219_v62, %v1217_v61  ;;  %1171 = vmatmul.bf16.gmra.mxu2 %v969_v63  ;;  %3107 = vtanh.f32 %v861_v3  ;;  %v2801_v61 = vld [vmem:[#allocation11 + $0x8] sm:$0xff] }
 0x19b   : > { %1260 = vmatmul.bf16.gmra.mxu3 %v970_v0  ;;  %1821 = vmatpush.bf16.msrb.mxu2 %v2801_v61  ;;  %v2809_v62 = vld [vmem:[#allocation11 + $0x48] sm:$0xff] }
 0x19c   : > { %1422 = vmatmul.bf16.gmra.mxu0 %v1292_v1  ;;  %1511 = vmatmul.bf16.gmra.mxu1 %v1292_v1 }
 0x19d   : > { %v1132_v4 = vpop.f32.mrf.mxu2  ;;  %1910 = vmatpush.bf16.msrb.mxu3 %v2809_v62 }
 0x19e   : > { %v1221_v5 = vpop.f32.mrf.mxu3  ;;  %v773_v6 = vpop.f32.mrf.mxu0  ;;  %v1133_v12 = vadd.f32 %v3811_v22, %v1132_v4 }
 0x19f   : > { %v774_v7 = vadd.f32 %v773_v6, %v3758_v35  ;;  %v862_v8 = vpop.f32.mrf.mxu1  ;;  %v3106_v13 = vpop.eup %3105 }
 0x1a0   : > { %v863_v9 = vadd.f32 %v862_v8, %v3760_v37  ;;  %v3108_v15 = vpop.eup %3107  ;;  %v1222_v23 = vadd.f32 %v1221_v5, %v1133_v12 }
 0x1a1   : > { %3109 = vtanh.f32 %v774_v7 }
 0x1a2   : > { %3111 = vtanh.f32 %v863_v9 }
 0x1a5   : > { %v1134_v14 = vpop.f32.mrf.mxu2 }
 0x1a6   : > { %v1135_v16 = vadd.f32 %v3811_v22, %v1134_v14  ;;  %v1223_v17 = vpop.f32.mrf.mxu3  ;;  %v776_v18 = vpop.f32.mrf.mxu0 }
 0x1a7   : > { %v3110_v19 = vpop.eup %3109  ;;  %v865_v20 = vpop.f32.mrf.mxu1  ;;  %v777_v28 = vadd.f32 %v776_v18, %v3758_v35 }
 0x1a8   : > { %v3112_v21 = vpop.eup %3111  ;;  %v1224_v24 = vadd.f32 %v1223_v17, %v1135_v16  ;;  %v971_v25 = vpack.c.bf16 %v3110_v19, %v3106_v13  ;;  %v866_v29 = vadd.f32 %v865_v20, %v3760_v37 }
 0x1a9   : > { %v972_v26 = vpack.c.bf16 %v3112_v21, %v3108_v15  ;;  %3113 = vtanh.f32 %v777_v28 }
 0x1aa   : > { %v1293_v27 = vpack.c.bf16 %v1224_v24, %v1222_v23  ;;  %1176 = vmatmul.bf16.gmra.mxu2 %v971_v25  ;;  %3115 = vtanh.f32 %v866_v29 }
 0x1ab   : > { %1265 = vmatmul.bf16.gmra.mxu3 %v972_v26 }
 0x1ac   : > { %1427 = vmatmul.bf16.gmra.mxu0 %v1293_v27  ;;  %1516 = vmatmul.bf16.gmra.mxu1 %v1293_v27 }
 0x1ad   : > { %v1137_v30 = vpop.f32.mrf.mxu2 }
 0x1ae   : > { %v1226_v31 = vpop.f32.mrf.mxu3  ;;  %v778_v32 = vpop.f32.mrf.mxu0  ;;  %v1138_v38 = vadd.f32 %v3811_v22, %v1137_v30 }
 0x1af   : > { %v779_v33 = vadd.f32 %v778_v32, %v3758_v35  ;;  %v867_v34 = vpop.f32.mrf.mxu1  ;;  %v3114_v39 = vpop.eup %3113 }
 0x1b0   : > { %v868_v36 = vadd.f32 %v867_v34, %v3760_v37  ;;  %v3116_v41 = vpop.eup %3115  ;;  %v1227_v48 = vadd.f32 %v1226_v31, %v1138_v38 }
 0x1b1   : > { %3117 = vtanh.f32 %v779_v33 }
 0x1b2   : > { %3119 = vtanh.f32 %v868_v36 }
 0x1b5   : > { %v1139_v40 = vpop.f32.mrf.mxu2 }
 0x1b6   : > { %v1140_v42 = vadd.f32 %v3811_v22, %v1139_v40  ;;  %v1228_v43 = vpop.f32.mrf.mxu3  ;;  %v781_v44 = vpop.f32.mrf.mxu0 }
 0x1b7   : > { %v3118_v45 = vpop.eup %3117  ;;  %v870_v46 = vpop.f32.mrf.mxu1  ;;  %v782_v53 = vadd.f32 %v781_v44, %v3758_v35 }
 0x1b8   : > { %v3120_v47 = vpop.eup %3119  ;;  %v1229_v49 = vadd.f32 %v1228_v43, %v1140_v42  ;;  %v973_v50 = vpack.c.bf16 %v3118_v45, %v3114_v39  ;;  %v871_v54 = vadd.f32 %v870_v46, %v3760_v37 }
 0x1b9   : > { %v974_v51 = vpack.c.bf16 %v3120_v47, %v3116_v41  ;;  %3121 = vtanh.f32 %v782_v53 }
 0x1ba   : > { %v1294_v52 = vpack.c.bf16 %v1229_v49, %v1227_v48  ;;  %1181 = vmatmul.bf16.gmra.mxu2 %v973_v50  ;;  %3123 = vtanh.f32 %v871_v54  ;;  %v2800_v48 = vld [vmem:[#allocation11] sm:$0xff] }
 0x1bb   : > { %1270 = vmatmul.bf16.gmra.mxu3 %v974_v51  ;;  %v2808_v49 = vld [vmem:[#allocation11 + $0x40] sm:$0xff]  ;;  %1822 = vmatpush.bf16.msrb.mxu2 %v2800_v48 }
 0x1bc   : > { %1432 = vmatmul.bf16.gmra.mxu0 %v1294_v52  ;;  %1521 = vmatmul.bf16.gmra.mxu1 %v1294_v52 }
 0x1bd   : > { %v1142_v55 = vpop.f32.mrf.mxu2  ;;  %1911 = vmatpush.bf16.msrb.mxu3 %v2808_v49 }
 0x1be   : > { %v1231_v56 = vpop.f32.mrf.mxu3  ;;  %v783_v57 = vpop.f32.mrf.mxu0  ;;  %v1143_v63 = vadd.f32 %v3811_v22, %v1142_v55 }
 0x1bf   : > { %v784_v58 = vadd.f32 %v783_v57, %v3758_v35  ;;  %v872_v59 = vpop.f32.mrf.mxu1  ;;  %v3122_v0 = vpop.eup %3121 }
 0x1c0   : > { %v873_v60 = vadd.f32 %v872_v59, %v3760_v37  ;;  %v3124_v2 = vpop.eup %3123  ;;  %v1232_v9 = vadd.f32 %v1231_v56, %v1143_v63 }
 0x1c1   : > { %3125 = vtanh.f32 %v784_v58 }
 0x1c2   : > { %3127 = vtanh.f32 %v873_v60 }
 0x1c5   : > { %v1144_v1 = vpop.f32.mrf.mxu2 }
 0x1c6   : > { %v1145_v3 = vadd.f32 %v3811_v22, %v1144_v1  ;;  %v1233_v4 = vpop.f32.mrf.mxu3  ;;  %v786_v5 = vpop.f32.mrf.mxu0 }
 0x1c7   : > { %v3126_v6 = vpop.eup %3125  ;;  %v875_v7 = vpop.f32.mrf.mxu1  ;;  %v787_v14 = vadd.f32 %v786_v5, %v3758_v35 }
 0x1c8   : > { %v3128_v8 = vpop.eup %3127  ;;  %v1234_v10 = vadd.f32 %v1233_v4, %v1145_v3  ;;  %v975_v11 = vpack.c.bf16 %v3126_v6, %v3122_v0  ;;  %v876_v15 = vadd.f32 %v875_v7, %v3760_v37 }
 0x1c9   : > { %v976_v12 = vpack.c.bf16 %v3128_v8, %v3124_v2  ;;  %3129 = vtanh.f32 %v787_v14 }
 0x1ca   : > { %v1295_v13 = vpack.c.bf16 %v1234_v10, %v1232_v9  ;;  %1186 = vmatmul.bf16.gmra.mxu2 %v975_v11  ;;  %3131 = vtanh.f32 %v876_v15 }
 0x1cb   : > { %1275 = vmatmul.bf16.gmra.mxu3 %v976_v12  ;;  %v1323_v12 = vld [vmem:[%s4124_s6] sm:$0x3] }
 0x1cc   : > { %1437 = vmatmul.bf16.gmra.mxu0 %v1295_v13  ;;  %1526 = vmatmul.bf16.gmra.mxu1 %v1295_v13 }
 0x1cd   : > { %v1147_v16 = vpop.f32.mrf.mxu2 }
 0x1ce   : > { %v1236_v17 = vpop.f32.mrf.mxu3  ;;  %v788_v18 = vpop.f32.mrf.mxu0  ;;  %v1148_v23 = vadd.f32 %v3811_v22, %v1147_v16 }
 0x1cf   : > { %v789_v19 = vadd.f32 %v788_v18, %v3758_v35  ;;  %v877_v20 = vpop.f32.mrf.mxu1  ;;  %v3130_v24 = vpop.eup %3129  ;;  %v3859_v18 = vperm.slane %v1323_v12, 0 }
 0x1d0   : > { %v878_v21 = vadd.f32 %v877_v20, %v3760_v37  ;;  %v3132_v26 = vpop.eup %3131  ;;  %v1237_v33 = vadd.f32 %v1236_v17, %v1148_v23 }
 0x1d1   : > { %3133 = vtanh.f32 %v789_v19  ;;  %v3861_v19 = vperm.slane %v1323_v12, 1 }
 0x1d2   : > { %3135 = vtanh.f32 %v878_v21 }
 0x1d5   : > { %v1149_v25 = vpop.f32.mrf.mxu2 }
 0x1d6   : > { %v1150_v27 = vadd.f32 %v3811_v22, %v1149_v25  ;;  %v1238_v28 = vpop.f32.mrf.mxu3  ;;  %v791_v29 = vpop.f32.mrf.mxu0 }
 0x1d7   : > { %v3134_v30 = vpop.eup %3133  ;;  %v880_v31 = vpop.f32.mrf.mxu1  ;;  %v792_v40 = vadd.f32 %v791_v29, %v3758_v35 }
 0x1d8   : > { %v3136_v32 = vpop.eup %3135  ;;  %v1239_v34 = vadd.f32 %v1238_v28, %v1150_v27  ;;  %v977_v36 = vpack.c.bf16 %v3134_v30, %v3130_v24  ;;  %v881_v41 = vadd.f32 %v880_v31, %v3760_v37 }
 0x1d9   : > { %v978_v38 = vpack.c.bf16 %v3136_v32, %v3132_v26  ;;  %3137 = vtanh.f32 %v792_v40 }
 0x1da   : > { %v1296_v39 = vpack.c.bf16 %v1239_v34, %v1237_v33  ;;  %1191 = vmatmul.bf16.gmra.mxu2 %v977_v36  ;;  %3139 = vtanh.f32 %v881_v41 }
 0x1db   : > { %1280 = vmatmul.bf16.gmra.mxu3 %v978_v38 }
 0x1dc   : > { %1442 = vmatmul.bf16.gmra.mxu0 %v1296_v39  ;;  %1531 = vmatmul.bf16.gmra.mxu1 %v1296_v39 }
 0x1dd   : > { %v1152_v42 = vpop.f32.mrf.mxu2 }
 0x1de   : > { %v1241_v43 = vpop.f32.mrf.mxu3  ;;  %v793_v44 = vpop.f32.mrf.mxu0  ;;  %v1153_v50 = vadd.f32 %v3811_v22, %v1152_v42 }
 0x1df   : > { %v794_v45 = vadd.f32 %v793_v44, %v3758_v35  ;;  %v882_v46 = vpop.f32.mrf.mxu1  ;;  %v3138_v51 = vpop.eup %3137 }
 0x1e0   : > { %v883_v47 = vadd.f32 %v882_v46, %v3760_v37  ;;  %v3140_v53 = vpop.eup %3139  ;;  %v1242_v57 = vadd.f32 %v1241_v43, %v1153_v50 }
 0x1e1   : > { %3141 = vtanh.f32 %v794_v45 }
 0x1e2   : > { %3143 = vtanh.f32 %v883_v47 }
 0x1e5   : > { %v1154_v52 = vpop.f32.mrf.mxu2 }
 0x1e6   : > { %v1155_v54 = vadd.f32 %v3811_v22, %v1154_v52  ;;  %v1243_v55 = vpop.f32.mrf.mxu3 }
 0x1e7   : > { %v3142_v56 = vpop.eup %3141 }
 0x1e8   : > { %v3144_v35 = vpop.eup %3143  ;;  %v1244_v58 = vadd.f32 %v1243_v55, %v1155_v54  ;;  %v979_v59 = vpack.c.bf16 %v3142_v56, %v3138_v51 }
 0x1e9   : > { %v980_v37 = vpack.c.bf16 %v3144_v35, %v3140_v53 }
 0x1ea   : > { %v1297_v60 = vpack.c.bf16 %v1244_v58, %v1242_v57  ;;  %1196 = vmatmul.bf16.gmra.mxu2 %v979_v59 }
 0x1eb   : > { %1285 = vmatmul.bf16.gmra.mxu3 %v980_v37 }
 0x1ec   : > { %1447 = vmatmul.bf16.gmra.mxu0 %v1297_v60  ;;  %1536 = vmatmul.bf16.gmra.mxu1 %v1297_v60 }
 0x1ed   : > { %v1157_v61 = vpop.f32.mrf.mxu2 }
 0x1ee   : > { %v1246_v62 = vpop.f32.mrf.mxu3  ;;  %v1158_v63 = vadd.f32 %v3811_v22, %v1157_v61 }
 0x1f0   : > { %v1247_v3 = vadd.f32 %v1246_v62, %v1158_v63 }
 0x1f5   : > { %v1159_v0 = vpop.f32.mrf.mxu2 }
 0x1f6   : > { %v1160_v1 = vadd.f32 %v3811_v22, %v1159_v0  ;;  %v1248_v2 = vpop.f32.mrf.mxu3 }
 0x1f8   : > { %v1249_v4 = vadd.f32 %v1248_v2, %v1160_v1 }
 0x1fa   : > { %v1298_v5 = vpack.c.bf16 %v1249_v4, %v1247_v3 }
 0x1fc   : > { %1452 = vmatmul.bf16.gmra.mxu0 %v1298_v5  ;;  %1541 = vmatmul.bf16.gmra.mxu1 %v1298_v5 }
 0x1fd   : > { %v1162_v6 = vpop.f32.mrf.mxu2 }
 0x1fe   : > { %v1251_v7 = vpop.f32.mrf.mxu3  ;;  %v1163_v8 = vadd.f32 %v3811_v22, %v1162_v6 }
 0x200   : > { %v1252_v13 = vadd.f32 %v1251_v7, %v1163_v8 }
 0x205   : > { %v1164_v9 = vpop.f32.mrf.mxu2 }
 0x206   : > { %v1165_v10 = vadd.f32 %v3811_v22, %v1164_v9  ;;  %v1253_v11 = vpop.f32.mrf.mxu3 }
 0x208   : > { %v1254_v14 = vadd.f32 %v1253_v11, %v1165_v10 }
 0x209   : > { %v1418_v15 = vpop.f32.mrf.mxu0  ;;  %v1507_v16 = vpop.f32.mrf.mxu1 }
 0x20a   : > { %v1299_v17 = vpack.c.bf16 %v1254_v14, %v1252_v13  ;;  %v1419_v21 = vadd.f32 %v1418_v15, %v3859_v18  ;;  %v1508_v24 = vadd.f32 %v1507_v16, %v3861_v19 }
 0x20c   : > { %1457 = vmatmul.bf16.gmra.mxu0 %v1299_v17  ;;  %1546 = vmatmul.bf16.gmra.mxu1 %v1299_v17  ;;  %3145 = vtanh.f32 %v1419_v21 }
 0x20d   : > { %v1167_v20 = vpop.f32.mrf.mxu2  ;;  %3147 = vtanh.f32 %v1508_v24 }
 0x20e   : > { %v1256_v23 = vpop.f32.mrf.mxu3  ;;  %v1168_v29 = vadd.f32 %v3811_v22, %v1167_v20 }
 0x210   : > { %v1257_v34 = vadd.f32 %v1256_v23, %v1168_v29 }
 0x211   : > { %v1420_v25 = vpop.f32.mrf.mxu0  ;;  %v1509_v26 = vpop.f32.mrf.mxu1 }
 0x212   : > { %v1421_v27 = vadd.f32 %v1420_v25, %v3859_v18  ;;  %v1510_v28 = vadd.f32 %v1509_v26, %v3861_v19  ;;  %v3146_v33 = vpop.eup %3145 }
 0x213   : > { %v3148_v38 = vpop.eup %3147 }
 0x214   : > { %3149 = vtanh.f32 %v1421_v27 }
 0x215   : > { %3151 = vtanh.f32 %v1510_v28  ;;  %v1169_v30 = vpop.f32.mrf.mxu2 }
 0x216   : > { %v1170_v31 = vadd.f32 %v3811_v22, %v1169_v30  ;;  %v1258_v32 = vpop.f32.mrf.mxu3 }
 0x218   : > { %v1259_v36 = vadd.f32 %v1258_v32, %v1170_v31 }
 0x219   : > { %v1423_v39 = vpop.f32.mrf.mxu0  ;;  %v1512_v40 = vpop.f32.mrf.mxu1 }
 0x21a   : > { %v3150_v41 = vpop.eup %3149  ;;  %v1300_v42 = vpack.c.bf16 %v1259_v36, %v1257_v34  ;;  %v1424_v47 = vadd.f32 %v1423_v39, %v3859_v18  ;;  %v1513_v49 = vadd.f32 %v1512_v40, %v3861_v19 }
 0x21b   : > { %v3152_v43 = vpop.eup %3151  ;;  %v1651_v44 = vpack.c.bf16 %v3150_v41, %v3146_v33 }
 0x21c   : > { %1462 = vmatmul.bf16.gmra.mxu0 %v1300_v42  ;;  %1551 = vmatmul.bf16.gmra.mxu1 %v1300_v42  ;;  %v1652_v45 = vpack.c.bf16 %v3152_v43, %v3148_v38  ;;  %3153 = vtanh.f32 %v1424_v47 }
 0x21d   : > { %v1172_v46 = vpop.f32.mrf.mxu2  ;;  %1823 = vmatmul.bf16.vlgmr.msrb.gmra.mxu2 %v1651_v44  ;;  %3155 = vtanh.f32 %v1513_v49 }
 0x21e   : > { %v1261_v48 = vpop.f32.mrf.mxu3  ;;  %1912 = vmatmul.bf16.vlgmr.msrb.gmra.mxu3 %v1652_v45  ;;  %v1173_v54 = vadd.f32 %v3811_v22, %v1172_v46 }
 0x220   : > { %v1262_v58 = vadd.f32 %v1261_v48, %v1173_v54 }
 0x221   : > { %v1425_v50 = vpop.f32.mrf.mxu0  ;;  %v1514_v51 = vpop.f32.mrf.mxu1 }
 0x222   : > { %v1426_v52 = vadd.f32 %v1425_v50, %v3859_v18  ;;  %v1515_v53 = vadd.f32 %v1514_v51, %v3861_v19  ;;  %v3154_v57 = vpop.eup %3153 }
 0x223   : > { %v3156_v37 = vpop.eup %3155 }
 0x224   : > { %3157 = vtanh.f32 %v1426_v52 }
 0x225   : > { %3159 = vtanh.f32 %v1515_v53  ;;  %v1174_v55 = vpop.f32.mrf.mxu2 }
 0x226   : > { %v1175_v56 = vadd.f32 %v3811_v22, %v1174_v55  ;;  %v1263_v35 = vpop.f32.mrf.mxu3 }
 0x228   : > { %v1264_v59 = vadd.f32 %v1263_v35, %v1175_v56 }
 0x229   : > { %v1428_v60 = vpop.f32.mrf.mxu0  ;;  %v1517_v61 = vpop.f32.mrf.mxu1 }
 0x22a   : > { %v3158_v62 = vpop.eup %3157  ;;  %v1301_v63 = vpack.c.bf16 %v1264_v59, %v1262_v58  ;;  %v1429_v4 = vadd.f32 %v1428_v60, %v3859_v18  ;;  %v1518_v6 = vadd.f32 %v1517_v61, %v3861_v19 }
 0x22b   : > { %v3160_v0 = vpop.eup %3159  ;;  %v1653_v1 = vpack.c.bf16 %v3158_v62, %v3154_v57 }
 0x22c   : > { %1467 = vmatmul.bf16.gmra.mxu0 %v1301_v63  ;;  %1556 = vmatmul.bf16.gmra.mxu1 %v1301_v63  ;;  %v1654_v2 = vpack.c.bf16 %v3160_v0, %v3156_v37  ;;  %3161 = vtanh.f32 %v1429_v4 }
 0x22d   : > { %v1177_v3 = vpop.f32.mrf.mxu2  ;;  %1828 = vmatmul.bf16.gmra.mxu2 %v1653_v1  ;;  %3163 = vtanh.f32 %v1518_v6 }
 0x22e   : > { %v1266_v5 = vpop.f32.mrf.mxu3  ;;  %1917 = vmatmul.bf16.gmra.mxu3 %v1654_v2  ;;  %v1178_v11 = vadd.f32 %v3811_v22, %v1177_v3 }
 0x230   : > { %v1267_v16 = vadd.f32 %v1266_v5, %v1178_v11 }
 0x231   : > { %v1430_v7 = vpop.f32.mrf.mxu0  ;;  %v1519_v8 = vpop.f32.mrf.mxu1 }
 0x232   : > { %v1431_v9 = vadd.f32 %v1430_v7, %v3859_v18  ;;  %v1520_v10 = vadd.f32 %v1519_v8, %v3861_v19  ;;  %v3162_v15 = vpop.eup %3161 }
 0x233   : > { %v3164_v20 = vpop.eup %3163 }
 0x234   : > { %3165 = vtanh.f32 %v1431_v9 }
 0x235   : > { %3167 = vtanh.f32 %v1520_v10  ;;  %v1179_v12 = vpop.f32.mrf.mxu2 }
 0x236   : > { %v1180_v13 = vadd.f32 %v3811_v22, %v1179_v12  ;;  %v1268_v14 = vpop.f32.mrf.mxu3 }
 0x238   : > { %v1269_v17 = vadd.f32 %v1268_v14, %v1180_v13 }
 0x239   : > { %v1433_v21 = vpop.f32.mrf.mxu0  ;;  %v1522_v23 = vpop.f32.mrf.mxu1 }
 0x23a   : > { %v3166_v24 = vpop.eup %3165  ;;  %v1302_v25 = vpack.c.bf16 %v1269_v17, %v1267_v16  ;;  %v1434_v30 = vadd.f32 %v1433_v21, %v3859_v18  ;;  %v1523_v32 = vadd.f32 %v1522_v23, %v3861_v19 }
 0x23b   : > { %v3168_v26 = vpop.eup %3167  ;;  %v1655_v27 = vpack.c.bf16 %v3166_v24, %v3162_v15 }
 0x23c   : > { %1472 = vmatmul.bf16.gmra.mxu0 %v1302_v25  ;;  %1561 = vmatmul.bf16.gmra.mxu1 %v1302_v25  ;;  %v1656_v28 = vpack.c.bf16 %v3168_v26, %v3164_v20  ;;  %3169 = vtanh.f32 %v1434_v30 }
 0x23d   : > { %v1182_v29 = vpop.f32.mrf.mxu2  ;;  %1833 = vmatmul.bf16.gmra.mxu2 %v1655_v27  ;;  %3171 = vtanh.f32 %v1523_v32 }
 0x23e   : > { %v1271_v31 = vpop.f32.mrf.mxu3  ;;  %1922 = vmatmul.bf16.gmra.mxu3 %v1656_v28  ;;  %v1183_v39 = vadd.f32 %v3811_v22, %v1182_v29 }
 0x240   : > { %v1272_v44 = vadd.f32 %v1271_v31, %v1183_v39 }
 0x241   : > { %v1435_v33 = vpop.f32.mrf.mxu0  ;;  %v1524_v34 = vpop.f32.mrf.mxu1 }
 0x242   : > { %v1436_v36 = vadd.f32 %v1435_v33, %v3859_v18  ;;  %v1525_v38 = vadd.f32 %v1524_v34, %v3861_v19  ;;  %v3170_v43 = vpop.eup %3169 }
 0x243   : > { %v3172_v46 = vpop.eup %3171 }
 0x244   : > { %3173 = vtanh.f32 %v1436_v36 }
 0x245   : > { %3175 = vtanh.f32 %v1525_v38  ;;  %v1184_v40 = vpop.f32.mrf.mxu2 }
 0x246   : > { %v1185_v41 = vadd.f32 %v3811_v22, %v1184_v40  ;;  %v1273_v42 = vpop.f32.mrf.mxu3 }
 0x248   : > { %v1274_v45 = vadd.f32 %v1273_v42, %v1185_v41 }
 0x249   : > { %v1438_v47 = vpop.f32.mrf.mxu0  ;;  %v1527_v48 = vpop.f32.mrf.mxu1 }
 0x24a   : > { %v3174_v49 = vpop.eup %3173  ;;  %v1303_v50 = vpack.c.bf16 %v1274_v45, %v1272_v44  ;;  %v1439_v55 = vadd.f32 %v1438_v47, %v3859_v18  ;;  %v1528_v35 = vadd.f32 %v1527_v48, %v3861_v19 }
 0x24b   : > { %v3176_v51 = vpop.eup %3175  ;;  %v1657_v52 = vpack.c.bf16 %v3174_v49, %v3170_v43 }
 0x24c   : > { %1477 = vmatmul.bf16.gmra.mxu0 %v1303_v50  ;;  %1566 = vmatmul.bf16.gmra.mxu1 %v1303_v50  ;;  %v1658_v53 = vpack.c.bf16 %v3176_v51, %v3172_v46  ;;  %3177 = vtanh.f32 %v1439_v55 }
 0x24d   : > { %v1187_v54 = vpop.f32.mrf.mxu2  ;;  %1838 = vmatmul.bf16.gmra.mxu2 %v1657_v52  ;;  %3179 = vtanh.f32 %v1528_v35 }
 0x24e   : > { %v1276_v56 = vpop.f32.mrf.mxu3  ;;  %1927 = vmatmul.bf16.gmra.mxu3 %v1658_v53  ;;  %v1188_v60 = vadd.f32 %v3811_v22, %v1187_v54 }
 0x250   : > { %v1277_v1 = vadd.f32 %v1276_v56, %v1188_v60 }
 0x251   : > { %v1440_v57 = vpop.f32.mrf.mxu0  ;;  %v1529_v58 = vpop.f32.mrf.mxu1 }
 0x252   : > { %v1441_v59 = vadd.f32 %v1440_v57, %v3859_v18  ;;  %v1530_v37 = vadd.f32 %v1529_v58, %v3861_v19  ;;  %v3178_v0 = vpop.eup %3177 }
 0x253   : > { %v3180_v3 = vpop.eup %3179 }
 0x254   : > { %3181 = vtanh.f32 %v1441_v59 }
 0x255   : > { %3183 = vtanh.f32 %v1530_v37  ;;  %v1189_v61 = vpop.f32.mrf.mxu2 }
 0x256   : > { %v1190_v62 = vadd.f32 %v3811_v22, %v1189_v61  ;;  %v1278_v63 = vpop.f32.mrf.mxu3 }
 0x258   : > { %v1279_v2 = vadd.f32 %v1278_v63, %v1190_v62 }
 0x259   : > { %v1443_v4 = vpop.f32.mrf.mxu0  ;;  %v1532_v5 = vpop.f32.mrf.mxu1 }
 0x25a   : > { %v3182_v6 = vpop.eup %3181  ;;  %v1304_v7 = vpack.c.bf16 %v1279_v2, %v1277_v1  ;;  %v1444_v12 = vadd.f32 %v1443_v4, %v3859_v18  ;;  %v1533_v14 = vadd.f32 %v1532_v5, %v3861_v19 }
 0x25b   : > { %v3184_v8 = vpop.eup %3183  ;;  %v1659_v9 = vpack.c.bf16 %v3182_v6, %v3178_v0 }
 0x25c   : > { %1482 = vmatmul.bf16.gmra.mxu0 %v1304_v7  ;;  %1571 = vmatmul.bf16.gmra.mxu1 %v1304_v7  ;;  %v1660_v10 = vpack.c.bf16 %v3184_v8, %v3180_v3  ;;  %3185 = vtanh.f32 %v1444_v12 }
 0x25d   : > { %v1192_v11 = vpop.f32.mrf.mxu2  ;;  %1843 = vmatmul.bf16.gmra.mxu2 %v1659_v9  ;;  %3187 = vtanh.f32 %v1533_v14 }
 0x25e   : > { %v1281_v13 = vpop.f32.mrf.mxu3  ;;  %1932 = vmatmul.bf16.gmra.mxu3 %v1660_v10  ;;  %v1193_v21 = vadd.f32 %v3811_v22, %v1192_v11 }
 0x260   : > { %v1282_v27 = vadd.f32 %v1281_v13, %v1193_v21 }
 0x261   : > { %v1445_v15 = vpop.f32.mrf.mxu0  ;;  %v1534_v16 = vpop.f32.mrf.mxu1 }
 0x262   : > { %v1446_v17 = vadd.f32 %v1445_v15, %v3859_v18  ;;  %v1535_v20 = vadd.f32 %v1534_v16, %v3861_v19  ;;  %v3186_v26 = vpop.eup %3185 }
 0x263   : > { %v3188_v29 = vpop.eup %3187 }
 0x264   : > { %3189 = vtanh.f32 %v1446_v17 }
 0x265   : > { %3191 = vtanh.f32 %v1535_v20  ;;  %v1194_v23 = vpop.f32.mrf.mxu2 }
 0x266   : > { %v1195_v24 = vadd.f32 %v3811_v22, %v1194_v23  ;;  %v1283_v25 = vpop.f32.mrf.mxu3 }
 0x268   : > { %v1284_v28 = vadd.f32 %v1283_v25, %v1195_v24 }
 0x269   : > { %v1448_v30 = vpop.f32.mrf.mxu0  ;;  %v1537_v31 = vpop.f32.mrf.mxu1 }
 0x26a   : > { %v3190_v32 = vpop.eup %3189  ;;  %v1305_v33 = vpack.c.bf16 %v1284_v28, %v1282_v27  ;;  %v1449_v40 = vadd.f32 %v1448_v30, %v3859_v18  ;;  %v1538_v42 = vadd.f32 %v1537_v31, %v3861_v19  ;;  %v477_v28 = vld [vmem:[%s3731_s24] sm:$0xff]  }
 0x26b   : > { %v3192_v34 = vpop.eup %3191  ;;  %v1661_v36 = vpack.c.bf16 %v3190_v32, %v3186_v26  ;;  %v3916_v26 = vld [vmem:[%s4126_s8] ss:$0 sm:$0xff] }
 0x26c   : > { %1487 = vmatmul.bf16.gmra.mxu0 %v1305_v33  ;;  %1576 = vmatmul.bf16.gmra.mxu1 %v1305_v33  ;;  %v1662_v38 = vpack.c.bf16 %v3192_v34, %v3188_v29  ;;  %3193 = vtanh.f32 %v1449_v40  ;;  %v2057_v34 = vunpack.c.l.bf16 %v477_v28 }
 0x26d   : > { %v1197_v39 = vpop.f32.mrf.mxu2  ;;  %1848 = vmatmul.bf16.gmra.mxu2 %v1661_v36  ;;  %3195 = vtanh.f32 %v1538_v42 }
 0x26e   : > { %v1286_v41 = vpop.f32.mrf.mxu3  ;;  %1937 = vmatmul.bf16.gmra.mxu3 %v1662_v38  ;;  %v1198_v47 = vadd.f32 %v3811_v22, %v1197_v39 }
 0x270   : > { %v1287_v52 = vadd.f32 %v1286_v41, %v1198_v47 }
 0x271   : > { %v1450_v43 = vpop.f32.mrf.mxu0  ;;  %v1539_v44 = vpop.f32.mrf.mxu1 }
 0x272   : > { %v1451_v45 = vadd.f32 %v1450_v43, %v3859_v18  ;;  %v1540_v46 = vadd.f32 %v1539_v44, %v3861_v19  ;;  %v3194_v51 = vpop.eup %3193 }
 0x273   : > { %v3196_v54 = vpop.eup %3195 }
 0x274   : > { %3197 = vtanh.f32 %v1451_v45 }
 0x275   : > { %3199 = vtanh.f32 %v1540_v46  ;;  %v1199_v48 = vpop.f32.mrf.mxu2 }
 0x276   : > { %v1200_v49 = vadd.f32 %v3811_v22, %v1199_v48  ;;  %v1288_v50 = vpop.f32.mrf.mxu3  ;;  %v2058_v48 = vunpack.c.h.bf16 %v477_v28 }
 0x278   : > { %v1289_v53 = vadd.f32 %v1288_v50, %v1200_v49 }
 0x279   : > { %v1453_v55 = vpop.f32.mrf.mxu0  ;;  %v1542_v56 = vpop.f32.mrf.mxu1 }
 0x27a   : > { %v3198_v35 = vpop.eup %3197  ;;  %v1306_v57 = vpack.c.bf16 %v1289_v53, %v1287_v52  ;;  %v1454_v60 = vadd.f32 %v1453_v55, %v3859_v18  ;;  %v1543_v22 = vadd.f32 %v1542_v56, %v3861_v19 }
 0x27b   : > { %v3200_v58 = vpop.eup %3199  ;;  %v1663_v59 = vpack.c.bf16 %v3198_v35, %v3194_v51 }
 0x27c   : > { %1492 = vmatmul.bf16.gmra.mxu0 %v1306_v57  ;;  %1581 = vmatmul.bf16.gmra.mxu1 %v1306_v57  ;;  %v1664_v37 = vpack.c.bf16 %v3200_v58, %v3196_v54  ;;  %3201 = vtanh.f32 %v1454_v60  ;;  %v479_v57 = vld [vmem:[%s3731_s24 + $0x8] sm:$0xff]  }
 0x27d   : > { %1853 = vmatmul.bf16.gmra.mxu2 %v1663_v59  ;;  %3203 = vtanh.f32 %v1543_v22 }
 0x27e   : > { %1942 = vmatmul.bf16.gmra.mxu3 %v1664_v37 }
 0x281   : > { %v1455_v61 = vpop.f32.mrf.mxu0  ;;  %v1544_v62 = vpop.f32.mrf.mxu1 }
 0x282   : > { %v1456_v63 = vadd.f32 %v1455_v61, %v3859_v18  ;;  %v1545_v0 = vadd.f32 %v1544_v62, %v3861_v19  ;;  %v3202_v1 = vpop.eup %3201  ;;  %v2059_v61 = vunpack.c.l.bf16 %v479_v57 }
 0x283   : > { %v3204_v2 = vpop.eup %3203 }
 0x284   : > { %3205 = vtanh.f32 %v1456_v63 }
 0x285   : > { %3207 = vtanh.f32 %v1545_v0 }
 0x289   : > { %v1458_v3 = vpop.f32.mrf.mxu0  ;;  %v1547_v4 = vpop.f32.mrf.mxu1 }
 0x28a   : > { %v3206_v5 = vpop.eup %3205  ;;  %v1459_v9 = vadd.f32 %v1458_v3, %v3859_v18  ;;  %v1548_v10 = vadd.f32 %v1547_v4, %v3861_v19 }
 0x28b   : > { %v3208_v6 = vpop.eup %3207  ;;  %v1665_v7 = vpack.c.bf16 %v3206_v5, %v3202_v1 }
 0x28c   : > { %v1666_v8 = vpack.c.bf16 %v3208_v6, %v3204_v2  ;;  %3209 = vtanh.f32 %v1459_v9  ;;  %v2060_v9 = vunpack.c.h.bf16 %v479_v57 }
 0x28d   : > { %1858 = vmatmul.bf16.gmra.mxu2 %v1665_v7  ;;  %3211 = vtanh.f32 %v1548_v10 }
 0x28e   : > { %1947 = vmatmul.bf16.gmra.mxu3 %v1666_v8 }
 0x291   : > { %v1460_v11 = vpop.f32.mrf.mxu0  ;;  %v1549_v12 = vpop.f32.mrf.mxu1 }
 0x292   : > { %v1461_v13 = vadd.f32 %v1460_v11, %v3859_v18  ;;  %v1550_v14 = vadd.f32 %v1549_v12, %v3861_v19  ;;  %v3210_v15 = vpop.eup %3209 }
 0x293   : > { %v3212_v16 = vpop.eup %3211 }
 0x294   : > { %3213 = vtanh.f32 %v1461_v13 }
 0x295   : > { %3215 = vtanh.f32 %v1550_v14 }
 0x299   : > { %v1463_v17 = vpop.f32.mrf.mxu0  ;;  %v1552_v20 = vpop.f32.mrf.mxu1 }
 0x29a   : > { %v3214_v21 = vpop.eup %3213  ;;  %v1464_v27 = vadd.f32 %v1463_v17, %v3859_v18  ;;  %v1553_v29 = vadd.f32 %v1552_v20, %v3861_v19 }
 0x29b   : > { %v3216_v23 = vpop.eup %3215  ;;  %v1667_v24 = vpack.c.bf16 %v3214_v21, %v3210_v15  ;;  %v481_v21 = vld [vmem:[%s3731_s24 + $0x10] sm:$0xff]  }
 0x29c   : > { %v1668_v25 = vpack.c.bf16 %v3216_v23, %v3212_v16  ;;  %3217 = vtanh.f32 %v1464_v27 }
 0x29d   : > { %1863 = vmatmul.bf16.gmra.mxu2 %v1667_v24  ;;  %3219 = vtanh.f32 %v1553_v29  ;;  %v2061_v29 = vunpack.c.l.bf16 %v481_v21 }
 0x29e   : > { %1952 = vmatmul.bf16.gmra.mxu3 %v1668_v25 }
 0x2a0   : > { %v1824_v30 = vpop.f32.mrf.mxu2 }
 0x2a1   : > { %v1825_v31 = vadd.f32 %v3916_v26, %v1824_v30  ;;  %v1913_v32 = vpop.f32.mrf.mxu3  ;;  %v1465_v33 = vpop.f32.mrf.mxu0 }
 0x2a2   : > { %v1466_v36 = vadd.f32 %v1465_v33, %v3859_v18  ;;  %v1554_v38 = vpop.f32.mrf.mxu1  ;;  %v3218_v42 = vpop.eup %3217 }
 0x2a3   : > { %v1914_v39 = vadd.f32 %v1913_v32, %v1825_v31  ;;  %v1555_v40 = vadd.f32 %v1554_v38, %v3861_v19  ;;  %v3220_v44 = vpop.eup %3219 }
 0x2a4   : > { %3221 = vtanh.f32 %v1466_v36 }
 0x2a5   : > { %3223 = vtanh.f32 %v1555_v40  ;;  %v2089_v41 = vmul.f32 %v2057_v34, %v1914_v39 }
 0x2a7   : > { %2121 = vadd.xlane.f32.xlu0 %v2089_v41 }
 0x2a8   : > { %v1826_v43 = vpop.f32.mrf.mxu2 }
 0x2a9   : > { %v1827_v45 = vadd.f32 %v3916_v26, %v1826_v43  ;;  %v1915_v46 = vpop.f32.mrf.mxu3  ;;  %v1468_v47 = vpop.f32.mrf.mxu0  ;;  %v2062_v43 = vunpack.c.h.bf16 %v481_v21 }
 0x2aa   : > { %v3222_v49 = vpop.eup %3221  ;;  %v1557_v50 = vpop.f32.mrf.mxu1  ;;  %v1469_v35 = vadd.f32 %v1468_v47, %v3859_v18 }
 0x2ab   : > { %v3224_v51 = vpop.eup %3223  ;;  %v1916_v52 = vadd.f32 %v1915_v46, %v1827_v45  ;;  %v1669_v53 = vpack.c.bf16 %v3222_v49, %v3218_v42  ;;  %v1558_v58 = vadd.f32 %v1557_v50, %v3861_v19 }
 0x2ac   : > { %v1670_v54 = vpack.c.bf16 %v3224_v51, %v3220_v44  ;;  %3225 = vtanh.f32 %v1469_v35 }
 0x2ad   : > { %v2820_v55 = vpack.c.bf16 %v1916_v52, %v1914_v39  ;;  %1868 = vmatmul.bf16.gmra.mxu2 %v1669_v53  ;;  %v2090_v56 = vmul.f32 %v2058_v48, %v1916_v52  ;;  %3227 = vtanh.f32 %v1558_v58  ;;  %v483_v53 = vld [vmem:[%s3731_s24 + $0x18] sm:$0xff]  }
 0x2ae   : > { %1957 = vmatmul.bf16.gmra.mxu3 %v1670_v54  ;;  %v2063_v58 = vunpack.c.l.bf16 %v483_v53 }
 0x2af   : > { %2821 = vst [vmem:[%s3929_s12] sm:$0xff] %v2820_v55   ;;  %2123 = vadd.xlane.f32.xlu0 %v2090_v56 }
 0x2b0   : > { %v1829_v59 = vpop.f32.mrf.mxu2 }
 0x2b1   : > { %v1830_v37 = vadd.f32 %v3916_v26, %v1829_v59  ;;  %v1918_v60 = vpop.f32.mrf.mxu3  ;;  %v1470_v22 = vpop.f32.mrf.mxu0 }
 0x2b2   : > { %v1471_v62 = vadd.f32 %v1470_v22, %v3859_v18  ;;  %v1559_v63 = vpop.f32.mrf.mxu1  ;;  %v3226_v3 = vpop.eup %3225 }
 0x2b3   : > { %v1919_v0 = vadd.f32 %v1918_v60, %v1830_v37  ;;  %v1560_v1 = vadd.f32 %v1559_v63, %v3861_v19  ;;  %v3228_v5 = vpop.eup %3227 }
 0x2b4   : > { %3229 = vtanh.f32 %v1471_v62 }
 0x2b5   : > { %3231 = vtanh.f32 %v1560_v1  ;;  %v2091_v2 = vmul.f32 %v2059_v61, %v1919_v0 }
 0x2b7   : > { %2125 = vadd.xlane.f32.xlu1 %v2091_v2 }
 0x2b8   : > { %v1831_v4 = vpop.f32.mrf.mxu2 }
 0x2b9   : > { %v1832_v6 = vadd.f32 %v3916_v26, %v1831_v4  ;;  %v1920_v7 = vpop.f32.mrf.mxu3  ;;  %v1473_v8 = vpop.f32.mrf.mxu0  ;;  %v2064_v4 = vunpack.c.h.bf16 %v483_v53 }
 0x2ba   : > { %v3230_v10 = vpop.eup %3229  ;;  %v1562_v11 = vpop.f32.mrf.mxu1  ;;  %v1474_v20 = vadd.f32 %v1473_v8, %v3859_v18 }
 0x2bb   : > { %v3232_v12 = vpop.eup %3231  ;;  %v1921_v13 = vadd.f32 %v1920_v7, %v1832_v6  ;;  %v1671_v14 = vpack.c.bf16 %v3230_v10, %v3226_v3  ;;  %v1563_v23 = vadd.f32 %v1562_v11, %v3861_v19 }
 0x2bc   : > { %v1672_v15 = vpack.c.bf16 %v3232_v12, %v3228_v5  ;;  %3233 = vtanh.f32 %v1474_v20 }
 0x2bd   : > { %v2825_v16 = vpack.c.bf16 %v1921_v13, %v1919_v0  ;;  %1873 = vmatmul.bf16.gmra.mxu2 %v1671_v14  ;;  %v2092_v17 = vmul.f32 %v2060_v9, %v1921_v13  ;;  %3235 = vtanh.f32 %v1563_v23  ;;  %v485_v14 = vld [vmem:[%s3731_s24 + $0x20] sm:$0xff]  }
 0x2be   : > { %1962 = vmatmul.bf16.gmra.mxu3 %v1672_v15  ;;  %v2065_v23 = vunpack.c.l.bf16 %v485_v14 }
 0x2bf   : > { %2897 = vst [vmem:[%s3929_s12 + $0x8] sm:$0xff] %v2825_v16   ;;  %2127 = vadd.xlane.f32.xlu1 %v2092_v17 }
 0x2c0   : > { %v1834_v24 = vpop.f32.mrf.mxu2 }
 0x2c1   : > { %v1835_v25 = vadd.f32 %v3916_v26, %v1834_v24  ;;  %v1923_v27 = vpop.f32.mrf.mxu3  ;;  %v1475_v28 = vpop.f32.mrf.mxu0 }
 0x2c2   : > { %v1476_v30 = vadd.f32 %v1475_v28, %v3859_v18  ;;  %v1564_v31 = vpop.f32.mrf.mxu1  ;;  %v3234_v36 = vpop.eup %3233 }
 0x2c3   : > { %v1924_v32 = vadd.f32 %v1923_v27, %v1835_v25  ;;  %v1565_v33 = vadd.f32 %v1564_v31, %v3861_v19  ;;  %v3236_v39 = vpop.eup %3235 }
 0x2c4   : > { %3237 = vtanh.f32 %v1476_v30 }
 0x2c5   : > { %3239 = vtanh.f32 %v1565_v33  ;;  %v2093_v34 = vmul.f32 %v2061_v29, %v1924_v32 }
 0x2c7   : > { %2129 = vadd.xlane.f32.xlu2 %v2093_v34 }
 0x2c8   : > { %v1836_v38 = vpop.f32.mrf.mxu2 }
 0x2c9   : > { %v1837_v40 = vadd.f32 %v3916_v26, %v1836_v38  ;;  %v1925_v41 = vpop.f32.mrf.mxu3  ;;  %v1478_v42 = vpop.f32.mrf.mxu0  ;;  %v2066_v38 = vunpack.c.h.bf16 %v485_v14 }
 0x2ca   : > { %v3238_v44 = vpop.eup %3237  ;;  %v1567_v45 = vpop.f32.mrf.mxu1  ;;  %v1479_v52 = vadd.f32 %v1478_v42, %v3859_v18 }
 0x2cb   : > { %v3240_v46 = vpop.eup %3239  ;;  %v1926_v47 = vadd.f32 %v1925_v41, %v1837_v40  ;;  %v1673_v48 = vpack.c.bf16 %v3238_v44, %v3234_v36  ;;  %v1568_v54 = vadd.f32 %v1567_v45, %v3861_v19 }
 0x2cc   : > { %v1674_v49 = vpack.c.bf16 %v3240_v46, %v3236_v39  ;;  %3241 = vtanh.f32 %v1479_v52 }
 0x2cd   : > { %v2830_v50 = vpack.c.bf16 %v1926_v47, %v1924_v32  ;;  %1878 = vmatmul.bf16.gmra.mxu2 %v1673_v48  ;;  %v2094_v51 = vmul.f32 %v2062_v43, %v1926_v47  ;;  %3243 = vtanh.f32 %v1568_v54  ;;  %v487_v48 = vld [vmem:[%s3731_s24 + $0x28] sm:$0xff]  }
 0x2ce   : > { %1967 = vmatmul.bf16.gmra.mxu3 %v1674_v49  ;;  %v2067_v54 = vunpack.c.l.bf16 %v487_v48 }
 0x2cf   : > { %2898 = vst [vmem:[%s3929_s12 + $0x10] sm:$0xff] %v2830_v50   ;;  %2131 = vadd.xlane.f32.xlu2 %v2094_v51 }
 0x2d0   : > { %v1839_v55 = vpop.f32.mrf.mxu2 }
 0x2d1   : > { %v1840_v56 = vadd.f32 %v3916_v26, %v1839_v55  ;;  %v1928_v35 = vpop.f32.mrf.mxu3  ;;  %v1480_v57 = vpop.f32.mrf.mxu0 }
 0x2d2   : > { %v1481_v59 = vadd.f32 %v1480_v57, %v3859_v18  ;;  %v1569_v37 = vpop.f32.mrf.mxu1  ;;  %v3242_v62 = vpop.eup %3241 }
 0x2d3   : > { %v1929_v60 = vadd.f32 %v1928_v35, %v1840_v56  ;;  %v1570_v22 = vadd.f32 %v1569_v37, %v3861_v19  ;;  %v3244_v0 = vpop.eup %3243 }
 0x2d4   : > { %3245 = vtanh.f32 %v1481_v59 }
 0x2d5   : > { %3247 = vtanh.f32 %v1570_v22  ;;  %v2095_v61 = vmul.f32 %v2063_v58, %v1929_v60 }
 0x2d7   : > { %2133 = vadd.xlane.f32.xlu0 %v2095_v61 }
 0x2d8   : > { %v1841_v63 = vpop.f32.mrf.mxu2 }
 0x2d9   : > { %v1842_v1 = vadd.f32 %v3916_v26, %v1841_v63  ;;  %v1930_v2 = vpop.f32.mrf.mxu3  ;;  %v1483_v3 = vpop.f32.mrf.mxu0  ;;  %v2068_v63 = vunpack.c.h.bf16 %v487_v48 }
 0x2da   : > { %v3246_v5 = vpop.eup %3245  ;;  %v1572_v6 = vpop.f32.mrf.mxu1  ;;  %v1484_v13 = vadd.f32 %v1483_v3, %v3859_v18 }
 0x2db   : > { %v3248_v7 = vpop.eup %3247  ;;  %v1931_v8 = vadd.f32 %v1930_v2, %v1842_v1  ;;  %v1675_v9 = vpack.c.bf16 %v3246_v5, %v3242_v62  ;;  %v1573_v15 = vadd.f32 %v1572_v6, %v3861_v19 }
 0x2dc   : > { %v1676_v10 = vpack.c.bf16 %v3248_v7, %v3244_v0  ;;  %3249 = vtanh.f32 %v1484_v13 }
 0x2dd   : > { %v2835_v11 = vpack.c.bf16 %v1931_v8, %v1929_v60  ;;  %1883 = vmatmul.bf16.gmra.mxu2 %v1675_v9  ;;  %v2096_v12 = vmul.f32 %v2064_v4, %v1931_v8  ;;  %3251 = vtanh.f32 %v1573_v15  ;;  %v489_v9 = vld [vmem:[%s3731_s24 + $0x30] sm:$0xff]  }
 0x2de   : > { %1972 = vmatmul.bf16.gmra.mxu3 %v1676_v10  ;;  %v2069_v15 = vunpack.c.l.bf16 %v489_v9 }
 0x2df   : > { %2899 = vst [vmem:[%s3929_s12 + $0x18] sm:$0xff] %v2835_v11   ;;  %2135 = vadd.xlane.f32.xlu1 %v2096_v12 }
 0x2e0   : > { %v1844_v16 = vpop.f32.mrf.mxu2 }
 0x2e1   : > { %v1845_v17 = vadd.f32 %v3916_v26, %v1844_v16  ;;  %v1933_v20 = vpop.f32.mrf.mxu3  ;;  %v1485_v21 = vpop.f32.mrf.mxu0 }
 0x2e2   : > { %v1486_v24 = vadd.f32 %v1485_v21, %v3859_v18  ;;  %v1574_v25 = vpop.f32.mrf.mxu1  ;;  %v3250_v30 = vpop.eup %3249 }
 0x2e3   : > { %v1934_v27 = vadd.f32 %v1933_v20, %v1845_v17  ;;  %v1575_v28 = vadd.f32 %v1574_v25, %v3861_v19  ;;  %v3252_v32 = vpop.eup %3251 }
 0x2e4   : > { %3253 = vtanh.f32 %v1486_v24 }
 0x2e5   : > { %3255 = vtanh.f32 %v1575_v28  ;;  %v2097_v29 = vmul.f32 %v2065_v23, %v1934_v27 }
 0x2e7   : > { %2137 = vadd.xlane.f32.xlu2 %v2097_v29 }
 0x2e8   : > { %v1846_v31 = vpop.f32.mrf.mxu2 }
 0x2e9   : > { %v1847_v33 = vadd.f32 %v3916_v26, %v1846_v31  ;;  %v1935_v34 = vpop.f32.mrf.mxu3  ;;  %v1488_v36 = vpop.f32.mrf.mxu0 }
 0x2ea   : > { %v3254_v39 = vpop.eup %3253  ;;  %v1577_v40 = vpop.f32.mrf.mxu1  ;;  %v1489_v47 = vadd.f32 %v1488_v36, %v3859_v18 }
 0x2eb   : > { %v3256_v41 = vpop.eup %3255  ;;  %v1936_v42 = vadd.f32 %v1935_v34, %v1847_v33  ;;  %v1677_v43 = vpack.c.bf16 %v3254_v39, %v3250_v30  ;;  %v1578_v49 = vadd.f32 %v1577_v40, %v3861_v19  ;;  %v2070_v30 = vunpack.c.h.bf16 %v489_v9 }
 0x2ec   : > { %v1678_v44 = vpack.c.bf16 %v3256_v41, %v3252_v32  ;;  %3257 = vtanh.f32 %v1489_v47 }
 0x2ed   : > { %v2840_v45 = vpack.c.bf16 %v1936_v42, %v1934_v27  ;;  %1888 = vmatmul.bf16.gmra.mxu2 %v1677_v43  ;;  %v2098_v46 = vmul.f32 %v2066_v38, %v1936_v42  ;;  %3259 = vtanh.f32 %v1578_v49  ;;  %v491_v38 = vld [vmem:[%s3731_s24 + $0x38] sm:$0xff]  }
 0x2ee   : > { %1977 = vmatmul.bf16.gmra.mxu3 %v1678_v44  ;;  %v2071_v42 = vunpack.c.l.bf16 %v491_v38  ;;  %v2072_v48 = vunpack.c.h.bf16 %v491_v38  ;;  %v499_v38 = vld [vmem:[%s3731_s24 + $0x58] sm:$0xff]  }
 0x2ef   : > { %2900 = vst [vmem:[%s3929_s12 + $0x20] sm:$0xff] %v2840_v45   ;;  %2139 = vadd.xlane.f32.xlu0 %v2098_v46 }
 0x2f0   : > { %v1849_v50 = vpop.f32.mrf.mxu2 }
 0x2f1   : > { %v1850_v51 = vadd.f32 %v3916_v26, %v1849_v50  ;;  %v1938_v52 = vpop.f32.mrf.mxu3  ;;  %v1490_v53 = vpop.f32.mrf.mxu0 }
 0x2f2   : > { %v1491_v55 = vadd.f32 %v1490_v53, %v3859_v18  ;;  %v1579_v56 = vpop.f32.mrf.mxu1  ;;  %v3258_v59 = vpop.eup %3257  ;;  %v493_v53 = vld [vmem:[%s3731_s24 + $0x40] sm:$0xff]  }
 0x2f3   : > { %v1939_v35 = vadd.f32 %v1938_v52, %v1850_v51  ;;  %v1580_v57 = vadd.f32 %v1579_v56, %v3861_v19  ;;  %v3260_v60 = vpop.eup %3259 }
 0x2f4   : > { %3261 = vtanh.f32 %v1491_v55 }
 0x2f5   : > { %3263 = vtanh.f32 %v1580_v57  ;;  %v2099_v58 = vmul.f32 %v2067_v54, %v1939_v35 }
 0x2f7   : > { %2141 = vadd.xlane.f32.xlu1 %v2099_v58 }
 0x2f8   : > { %v1851_v37 = vpop.f32.mrf.mxu2 }
 0x2f9   : > { %v1852_v22 = vadd.f32 %v3916_v26, %v1851_v37  ;;  %v1940_v61 = vpop.f32.mrf.mxu3  ;;  %v1493_v62 = vpop.f32.mrf.mxu0 }
 0x2fa   : > { %v3262_v0 = vpop.eup %3261  ;;  %v1582_v1 = vpop.f32.mrf.mxu1  ;;  %v1494_v8 = vadd.f32 %v1493_v62, %v3859_v18 }
 0x2fb   : > { %v3264_v2 = vpop.eup %3263  ;;  %v1941_v3 = vadd.f32 %v1940_v61, %v1852_v22  ;;  %v1679_v4 = vpack.c.bf16 %v3262_v0, %v3258_v59  ;;  %v1583_v10 = vadd.f32 %v1582_v1, %v3861_v19  ;;  %v2074_v61 = vunpack.c.h.bf16 %v493_v53 }
 0x2fc   : > { %v1680_v5 = vpack.c.bf16 %v3264_v2, %v3260_v60  ;;  %3265 = vtanh.f32 %v1494_v8  ;;  %v495_v2 = vld [vmem:[%s3731_s24 + $0x48] sm:$0xff]  }
 0x2fd   : > { %v2845_v6 = vpack.c.bf16 %v1941_v3, %v1939_v35  ;;  %1893 = vmatmul.bf16.gmra.mxu2 %v1679_v4  ;;  %v2100_v7 = vmul.f32 %v2068_v63, %v1941_v3  ;;  %3267 = vtanh.f32 %v1583_v10  ;;  %v2073_v35 = vunpack.c.l.bf16 %v493_v53 }
 0x2fe   : > { %1982 = vmatmul.bf16.gmra.mxu3 %v1680_v5 }
 0x2ff   : > { %2901 = vst [vmem:[%s3929_s12 + $0x28] sm:$0xff] %v2845_v6   ;;  %2143 = vadd.xlane.f32.xlu2 %v2100_v7  ;;  %v2075_v6 = vunpack.c.l.bf16 %v495_v2 }
 0x300   : > { %v1854_v11 = vpop.f32.mrf.mxu2 }
 0x301   : > { %v1855_v12 = vadd.f32 %v3916_v26, %v1854_v11  ;;  %v1943_v13 = vpop.f32.mrf.mxu3  ;;  %v1495_v14 = vpop.f32.mrf.mxu0 }
 0x302   : > { %v1496_v16 = vadd.f32 %v1495_v14, %v3859_v18  ;;  %v1584_v17 = vpop.f32.mrf.mxu1  ;;  %v3266_v24 = vpop.eup %3265 }
 0x303   : > { %v1944_v20 = vadd.f32 %v1943_v13, %v1855_v12  ;;  %v1585_v21 = vadd.f32 %v1584_v17, %v3861_v19  ;;  %v3268_v27 = vpop.eup %3267  ;;  %v2076_v13 = vunpack.c.h.bf16 %v495_v2 }
 0x304   : > { %3269 = vtanh.f32 %v1496_v16 }
 0x305   : > { %3271 = vtanh.f32 %v1585_v21  ;;  %v2101_v23 = vmul.f32 %v2069_v15, %v1944_v20 }
 0x307   : > { %2145 = vadd.xlane.f32.xlu0 %v2101_v23 }
 0x308   : > { %v1856_v25 = vpop.f32.mrf.mxu2 }
 0x309   : > { %v1857_v28 = vadd.f32 %v3916_v26, %v1856_v25  ;;  %v1945_v29 = vpop.f32.mrf.mxu3 }
 0x30a   : > { %v3270_v18 = vpop.eup %3269 }
 0x30b   : > { %v3272_v31 = vpop.eup %3271  ;;  %v1946_v32 = vadd.f32 %v1945_v29, %v1857_v28  ;;  %v1681_v33 = vpack.c.bf16 %v3270_v18, %v3266_v24 }
 0x30c   : > { %v1682_v34 = vpack.c.bf16 %v3272_v31, %v3268_v27 }
 0x30d   : > { %v2850_v19 = vpack.c.bf16 %v1946_v32, %v1944_v20  ;;  %1898 = vmatmul.bf16.gmra.mxu2 %v1681_v33  ;;  %v2102_v36 = vmul.f32 %v2070_v30, %v1946_v32  ;;  %v497_v20 = vld [vmem:[%s3731_s24 + $0x50] sm:$0xff]  }
 0x30e   : > { %1987 = vmatmul.bf16.gmra.mxu3 %v1682_v34  ;;  %v2077_v25 = vunpack.c.l.bf16 %v497_v20  ;;  %v2078_v32 = vunpack.c.h.bf16 %v497_v20 }
 0x30f   : > { %2902 = vst [vmem:[%s3929_s12 + $0x30] sm:$0xff] %v2850_v19   ;;  %2147 = vadd.xlane.f32.xlu1 %v2102_v36 }
 0x310   : > { %v1859_v39 = vpop.f32.mrf.mxu2 }
 0x311   : > { %v1860_v40 = vadd.f32 %v3916_v26, %v1859_v39  ;;  %v1948_v41 = vpop.f32.mrf.mxu3 }
 0x313   : > { %v1949_v43 = vadd.f32 %v1948_v41, %v1860_v40 }
 0x315   : > { %v2103_v44 = vmul.f32 %v2071_v42, %v1949_v43  ;;  %v2079_v42 = vunpack.c.l.bf16 %v499_v38 }
 0x317   : > { %2149 = vadd.xlane.f32.xlu2 %v2103_v44 }
 0x318   : > { %v1861_v45 = vpop.f32.mrf.mxu2 }
 0x319   : > { %v1862_v46 = vadd.f32 %v3916_v26, %v1861_v45  ;;  %v1950_v47 = vpop.f32.mrf.mxu3 }
 0x31a   : > { %v2122_v49 = vpop.xlane.xlu0 %2121 }
 0x31b   : > { %v1951_v50 = vadd.f32 %v1950_v47, %v1862_v46  ;;  %2186 = vst.msk [vmem:[%s3984_s3] sm:$0xff] %vm2185_vm0, %v2122_v49  ;;  %v2080_v49 = vunpack.c.h.bf16 %v499_v38 }
 0x31d   : > { %v2855_v51 = vpack.c.bf16 %v1951_v50, %v1949_v43  ;;  %v2104_v52 = vmul.f32 %v2072_v48, %v1951_v50 }
 0x31f   : > { %2903 = vst [vmem:[%s3929_s12 + $0x38] sm:$0xff] %v2855_v51   ;;  %2151 = vadd.xlane.f32.xlu0 %v2104_v52 }
 0x320   : > { %v1864_v54 = vpop.f32.mrf.mxu2 }
 0x321   : > { %v1865_v55 = vadd.f32 %v3916_v26, %v1864_v54  ;;  %v1953_v56 = vpop.f32.mrf.mxu3  ;;  %v501_v54 = vld [vmem:[%s3731_s24 + $0x60] sm:$0xff]  }
 0x322   : > { %v2124_v57 = vpop.xlane.xlu0 %2123 }
 0x323   : > { %v1954_v58 = vadd.f32 %v1953_v56, %v1865_v55  ;;  %2187 = vst.msk [vmem:[%s3984_s3 + $0x8] sm:$0xff] %vm2185_vm0, %v2124_v57  ;;  %v2081_v57 = vunpack.c.l.bf16 %v501_v54 }
 0x325   : > { %v2105_v59 = vmul.f32 %v2073_v35, %v1954_v58 }
 0x327   : > { %2153 = vadd.xlane.f32.xlu1 %v2105_v59 }
 0x328   : > { %v1866_v37 = vpop.f32.mrf.mxu2 }
 0x329   : > { %v1867_v60 = vadd.f32 %v3916_v26, %v1866_v37  ;;  %v1955_v22 = vpop.f32.mrf.mxu3 }
 0x32a   : > { %v2126_v62 = vpop.xlane.xlu1 %2125 }
 0x32b   : > { %v1956_v63 = vadd.f32 %v1955_v22, %v1867_v60  ;;  %2188 = vst.msk [vmem:[%s3984_s3 + $0x10] sm:$0xff] %vm2185_vm0, %v2126_v62  ;;  %v2082_v62 = vunpack.c.h.bf16 %v501_v54 }
 0x32d   : > { %v2860_v0 = vpack.c.bf16 %v1956_v63, %v1954_v58  ;;  %v2106_v1 = vmul.f32 %v2074_v61, %v1956_v63 }
 0x32f   : > { %2904 = vst [vmem:[%s3929_s12 + $0x40] sm:$0xff] %v2860_v0   ;;  %2155 = vadd.xlane.f32.xlu2 %v2106_v1 }
 0x330   : > { %v1869_v3 = vpop.f32.mrf.mxu2 }
 0x331   : > { %v1870_v4 = vadd.f32 %v3916_v26, %v1869_v3  ;;  %v1958_v5 = vpop.f32.mrf.mxu3  ;;  %v503_v3 = vld [vmem:[%s3731_s24 + $0x68] sm:$0xff]  }
 0x332   : > { %v2128_v7 = vpop.xlane.xlu1 %2127 }
 0x333   : > { %v1959_v8 = vadd.f32 %v1958_v5, %v1870_v4  ;;  %2189 = vst.msk [vmem:[%s3984_s3 + $0x18] sm:$0xff] %vm2185_vm0, %v2128_v7  ;;  %v2083_v7 = vunpack.c.l.bf16 %v503_v3 }
 0x335   : > { %v2107_v9 = vmul.f32 %v2075_v6, %v1959_v8 }
 0x337   : > { %2157 = vadd.xlane.f32.xlu0 %v2107_v9 }
 0x338   : > { %v1871_v10 = vpop.f32.mrf.mxu2 }
 0x339   : > { %v1872_v11 = vadd.f32 %v3916_v26, %v1871_v10  ;;  %v1960_v12 = vpop.f32.mrf.mxu3 }
 0x33a   : > { %v2130_v14 = vpop.xlane.xlu2 %2129 }
 0x33b   : > { %v1961_v15 = vadd.f32 %v1960_v12, %v1872_v11  ;;  %2190 = vst.msk [vmem:[%s3984_s3 + $0x20] sm:$0xff] %vm2185_vm0, %v2130_v14  ;;  %v2084_v14 = vunpack.c.h.bf16 %v503_v3 }
 0x33d   : > { %v2865_v16 = vpack.c.bf16 %v1961_v15, %v1959_v8  ;;  %v2108_v17 = vmul.f32 %v2076_v13, %v1961_v15 }
 0x33f   : > { %2905 = vst [vmem:[%s3929_s12 + $0x48] sm:$0xff] %v2865_v16   ;;  %2159 = vadd.xlane.f32.xlu1 %v2108_v17 }
 0x340   : > { %v1874_v21 = vpop.f32.mrf.mxu2 }
 0x341   : > { %v1875_v23 = vadd.f32 %v3916_v26, %v1874_v21  ;;  %v1963_v24 = vpop.f32.mrf.mxu3  ;;  %v505_v21 = vld [vmem:[%s3731_s24 + $0x70] sm:$0xff]  }
 0x342   : > { %v2132_v27 = vpop.xlane.xlu2 %2131 }
 0x343   : > { %v1964_v28 = vadd.f32 %v1963_v24, %v1875_v23  ;;  %2191 = vst.msk [vmem:[%s3984_s3 + $0x28] sm:$0xff] %vm2185_vm0, %v2132_v27  ;;  %v2085_v27 = vunpack.c.l.bf16 %v505_v21 }
 0x345   : > { %v2109_v29 = vmul.f32 %v2077_v25, %v1964_v28 }
 0x347   : > { %2161 = vadd.xlane.f32.xlu2 %v2109_v29 }
 0x348   : > { %v1876_v30 = vpop.f32.mrf.mxu2 }
 0x349   : > { %v1877_v18 = vadd.f32 %v3916_v26, %v1876_v30  ;;  %v1965_v31 = vpop.f32.mrf.mxu3 }
 0x34a   : > { %v2134_v33 = vpop.xlane.xlu0 %2133 }
 0x34b   : > { %v1966_v34 = vadd.f32 %v1965_v31, %v1877_v18  ;;  %2192 = vst.msk [vmem:[%s3984_s3 + $0x30] sm:$0xff] %vm2185_vm0, %v2134_v33  ;;  %v2086_v33 = vunpack.c.h.bf16 %v505_v21 }
 0x34d   : > { %v2870_v19 = vpack.c.bf16 %v1966_v34, %v1964_v28  ;;  %v2110_v36 = vmul.f32 %v2078_v32, %v1966_v34 }
 0x34f   : > { %2906 = vst [vmem:[%s3929_s12 + $0x50] sm:$0xff] %v2870_v19   ;;  %2163 = vadd.xlane.f32.xlu0 %v2110_v36 }
 0x350   : > { %v1879_v39 = vpop.f32.mrf.mxu2 }
 0x351   : > { %v1880_v40 = vadd.f32 %v3916_v26, %v1879_v39  ;;  %v1968_v41 = vpop.f32.mrf.mxu3  ;;  %v507_v39 = vld [vmem:[%s3731_s24 + $0x78] sm:$0xff]   ;;  %s2235_s24 = scalar_lea.hbm %s4127_s9, %s2816_s5 }
 0x352   : > { %v2136_v43 = vpop.xlane.xlu1 %2135  ;;  %s2238_s27 = sshll.u32 %s2235_s24, 4  ;;  %s2239_s27 = int_to_ptr.hbm [resolvable:$true] %s2238_s27 }
 0x353   : > { %v1969_v44 = vadd.f32 %v1968_v41, %v1880_v40  ;;  %2193 = vst.msk [vmem:[%s3984_s3 + $0x38] sm:$0xff] %vm2185_vm0, %v2136_v43  ;;  %v2087_v43 = vunpack.c.l.bf16 %v507_v39  ;;  %s3467_s18 = sshra.s32 %s2239_s27, 4  ;;  %s3468_s18 = int_to_ptr.hbm [resolvable:$true] %s3467_s18 }
 0x354   : > { %s3469_s19 = scalar_lea.hbm %s3468_s18, 128  ;;  %p3474_p8 = scmp.lt.s32.totalorder %s3468_s18, %s4127_s9 }
 0x355   : > { %v2111_v45 = vmul.f32 %v2079_v42, %v1969_v44  ;;  %p3470_p3 = scmp.ne.s32.totalorder %s3468_s18, %s3469_s19  ;;  %p3475_p7 = scmp.lt.s32.totalorder %s3473_s11, %s3469_s19 }
 0x357   : > { %2165 = vadd.xlane.f32.xlu1 %v2111_v45  ;;  %p3471_p5 = pnand %p3470_p3, %p3691_p13  ;;  %p3476_p9 = por %p3475_p7, %p3474_p8 }
 0x358   : > { %v1881_v46 = vpop.f32.mrf.mxu2 }
 0x359   : > { %v1882_v47 = vadd.f32 %v3916_v26, %v1881_v46  ;;  %v1970_v48 = vpop.f32.mrf.mxu3  ;;  %p3472_p12 = pneg %p3471_p5 }
 0x35a   : > { %v2138_v50 = vpop.xlane.xlu2 %2137 }
 0x35b   : > { %v1971_v51 = vadd.f32 %v1970_v48, %v1882_v47  ;;  %2194 = vst.msk [vmem:[%s3984_s3 + $0x40] sm:$0xff] %vm2185_vm0, %v2138_v50  ;;  %p3477_p10 = pnand %p3476_p9, %p3472_p12 }
 0x35d   : > { %v2875_v52 = vpack.c.bf16 %v1971_v51, %v1969_v44  ;;  %v2112_v53 = vmul.f32 %v2080_v49, %v1971_v51  ;;  %v2088_v49 = vunpack.c.h.bf16 %v507_v39 }
 0x35f   : > { %2907 = vst [vmem:[%s3929_s12 + $0x58] sm:$0xff] %v2875_v52   ;;  %2167 = vadd.xlane.f32.xlu2 %v2112_v53 }
 0x360   : > { %v1884_v55 = vpop.f32.mrf.mxu2 }
 0x361   : > { %v1885_v56 = vadd.f32 %v3916_v26, %v1884_v55  ;;  %v1973_v35 = vpop.f32.mrf.mxu3 }
 0x362   : > { %v2140_v58 = vpop.xlane.xlu0 %2139 }
 0x363   : > { %v1974_v59 = vadd.f32 %v1973_v35, %v1885_v56  ;;  %2195 = vst.msk [vmem:[%s3984_s3 + $0x48] sm:$0xff] %vm2185_vm0, %v2140_v58 }
 0x365   : > { %v2113_v37 = vmul.f32 %v2081_v57, %v1974_v59 }
 0x367   : > { %2169 = vadd.xlane.f32.xlu0 %v2113_v37 }
 0x368   : > { %v1886_v60 = vpop.f32.mrf.mxu2 }
 0x369   : > { %v1887_v22 = vadd.f32 %v3916_v26, %v1886_v60  ;;  %v1975_v61 = vpop.f32.mrf.mxu3 }
 0x36a   : > { %v2142_v63 = vpop.xlane.xlu1 %2141 }
 0x36b   : > { %v1976_v0 = vadd.f32 %v1975_v61, %v1887_v22  ;;  %2196 = vst.msk [vmem:[%s3984_s3 + $0x50] sm:$0xff] %vm2185_vm0, %v2142_v63 }
 0x36d   : > { %v2880_v1 = vpack.c.bf16 %v1976_v0, %v1974_v59  ;;  %v2114_v2 = vmul.f32 %v2082_v62, %v1976_v0 }
 0x36f   : > { %2908 = vst [vmem:[%s3929_s12 + $0x60] sm:$0xff] %v2880_v1   ;;  %2171 = vadd.xlane.f32.xlu1 %v2114_v2 }
 0x370   : > { %v1889_v4 = vpop.f32.mrf.mxu2 }
 0x371   : > { %v1890_v5 = vadd.f32 %v3916_v26, %v1889_v4  ;;  %v1978_v6 = vpop.f32.mrf.mxu3 }
 0x372   : > { %v2144_v8 = vpop.xlane.xlu2 %2143 }
 0x373   : > { %v1979_v9 = vadd.f32 %v1978_v6, %v1890_v5  ;;  %2197 = vst.msk [vmem:[%s3984_s3 + $0x58] sm:$0xff] %vm2185_vm0, %v2144_v8 }
 0x375   : > { %v2115_v10 = vmul.f32 %v2083_v7, %v1979_v9 }
 0x377   : > { %2173 = vadd.xlane.f32.xlu2 %v2115_v10 }
 0x378   : > { %v1891_v11 = vpop.f32.mrf.mxu2 }
 0x379   : > { %v1892_v12 = vadd.f32 %v3916_v26, %v1891_v11  ;;  %v1980_v13 = vpop.f32.mrf.mxu3 }
 0x37a   : > { %v2146_v15 = vpop.xlane.xlu0 %2145 }
 0x37b   : > { %v1981_v16 = vadd.f32 %v1980_v13, %v1892_v12  ;;  %2198 = vst.msk [vmem:[%s3984_s3 + $0x60] sm:$0xff] %vm2185_vm0, %v2146_v15 }
 0x37d   : > { %v2885_v17 = vpack.c.bf16 %v1981_v16, %v1979_v9  ;;  %v2116_v20 = vmul.f32 %v2084_v14, %v1981_v16 }
 0x37f   : > { %2909 = vst [vmem:[%s3929_s12 + $0x68] sm:$0xff] %v2885_v17   ;;  %2175 = vadd.xlane.f32.xlu0 %v2116_v20 }
 0x380   : > { %v1894_v23 = vpop.f32.mrf.mxu2 }
 0x381   : > { %v1895_v24 = vadd.f32 %v3916_v26, %v1894_v23  ;;  %v1983_v25 = vpop.f32.mrf.mxu3 }
 0x382   : > { %v2148_v28 = vpop.xlane.xlu1 %2147 }
 0x383   : > { %v1984_v29 = vadd.f32 %v1983_v25, %v1895_v24  ;;  %2199 = vst.msk [vmem:[%s3984_s3 + $0x68] sm:$0xff] %vm2185_vm0, %v2148_v28 }
 0x385   : > { %v2117_v30 = vmul.f32 %v2085_v27, %v1984_v29 }
 0x387   : > { %2177 = vadd.xlane.f32.xlu1 %v2117_v30 }
 0x388   : > { %v1896_v18 = vpop.f32.mrf.mxu2 }
 0x389   : > { %v1897_v31 = vadd.f32 %v3916_v26, %v1896_v18  ;;  %v1985_v32 = vpop.f32.mrf.mxu3 }
 0x38a   : > { %v2150_v34 = vpop.xlane.xlu2 %2149 }
 0x38b   : > { %v1986_v19 = vadd.f32 %v1985_v32, %v1897_v31  ;;  %2200 = vst.msk [vmem:[%s3984_s3 + $0x70] sm:$0xff] %vm2185_vm0, %v2150_v34 }
 0x38d   : > { %v2890_v36 = vpack.c.bf16 %v1986_v19, %v1984_v29  ;;  %v2118_v38 = vmul.f32 %v2086_v33, %v1986_v19 }
 0x38f   : > { %2910 = vst [vmem:[%s3929_s12 + $0x70] sm:$0xff] %v2890_v36   ;;  %2179 = vadd.xlane.f32.xlu2 %v2118_v38 }
 0x390   : > { %v1899_v40 = vpop.f32.mrf.mxu2 }
 0x391   : > { %v1900_v41 = vadd.f32 %v3916_v26, %v1899_v40  ;;  %v1988_v42 = vpop.f32.mrf.mxu3 }
 0x392   : > { %v2152_v44 = vpop.xlane.xlu0 %2151 }
 0x393   : > { %v1989_v45 = vadd.f32 %v1988_v42, %v1900_v41  ;;  %2201 = vst.msk [vmem:[%s3984_s3 + $0x78] sm:$0xff] %vm2185_vm0, %v2152_v44 }
 0x395   : > { %v2119_v46 = vmul.f32 %v2087_v43, %v1989_v45 }
 0x397   : > { %2181 = vadd.xlane.f32.xlu0 %v2119_v46 }
 0x398   : > { %v1901_v47 = vpop.f32.mrf.mxu2 }
 0x399   : > { %v1902_v48 = vadd.f32 %v3916_v26, %v1901_v47  ;;  %v1990_v50 = vpop.f32.mrf.mxu3 }
 0x39a   : > { %v2154_v51 = vpop.xlane.xlu1 %2153 }
 0x39b   : > { %v1991_v52 = vadd.f32 %v1990_v50, %v1902_v48  ;;  %2202 = vst.msk [vmem:[%s3984_s3 + $0x80] sm:$0xff] %vm2185_vm0, %v2154_v51 }
 0x39d   : > { %v2895_v53 = vpack.c.bf16 %v1991_v52, %v1989_v45  ;;  %v2120_v54 = vmul.f32 %v2088_v49, %v1991_v52 }
 0x39f   : > { %2911 = vst [vmem:[%s3929_s12 + $0x78] sm:$0xff] %v2895_v53   ;;  %2183 = vadd.xlane.f32.xlu1 %v2120_v54 }
 0x3a0   : > { %3480 = shalt.err (!%p3477_p10)
}
 0x3a1   : > { %s3542_s25 = smov 64   ;;  %s3543_s12 = smov 4  }
 0x3a2   : > { %2934 = dma.vmem_to_hbm [thread:$0]  (%p3691_p13), %s2237_s17, 2048, %s2239_s27, %s2219_s20, %s3542_s25, %s3542_s25, %s3543_s12   ;;  %v2156_v26 = vpop.xlane.xlu2 %2155 }
 0x3a3   : > { %2203 = vst.msk [vmem:[%s3984_s3 + $0x88] sm:$0xff] %vm2185_vm0, %v2156_v26 }
 0x3aa   : > { %v2158_v55 = vpop.xlane.xlu0 %2157 }
 0x3ab   : > { %2204 = vst.msk [vmem:[%s3984_s3 + $0x90] sm:$0xff] %vm2185_vm0, %v2158_v55 }
 0x3b2   : > { %v2160_v56 = vpop.xlane.xlu1 %2159 }
 0x3b3   : > { %2205 = vst.msk [vmem:[%s3984_s3 + $0x98] sm:$0xff] %vm2185_vm0, %v2160_v56 }
 0x3ba   : > { %v2162_v35 = vpop.xlane.xlu2 %2161 }
 0x3bb   : > { %2206 = vst.msk [vmem:[%s3984_s3 + $0xa0] sm:$0xff] %vm2185_vm0, %v2162_v35 }
 0x3c2   : > { %v2164_v57 = vpop.xlane.xlu0 %2163 }
 0x3c3   : > { %2207 = vst.msk [vmem:[%s3984_s3 + $0xa8] sm:$0xff] %vm2185_vm0, %v2164_v57 }
 0x3ca   : > { %v2166_v58 = vpop.xlane.xlu1 %2165 }
 0x3cb   : > { %2208 = vst.msk [vmem:[%s3984_s3 + $0xb0] sm:$0xff] %vm2185_vm0, %v2166_v58 }
 0x3d2   : > { %v2168_v59 = vpop.xlane.xlu2 %2167 }
 0x3d3   : > { %2209 = vst.msk [vmem:[%s3984_s3 + $0xb8] sm:$0xff] %vm2185_vm0, %v2168_v59 }
 0x3da   : > { %v2170_v37 = vpop.xlane.xlu0 %2169 }
 0x3db   : > { %2210 = vst.msk [vmem:[%s3984_s3 + $0xc0] sm:$0xff] %vm2185_vm0, %v2170_v37 }
 0x3e2   : > { %v2172_v60 = vpop.xlane.xlu1 %2171 }
 0x3e3   : > { %2211 = vst.msk [vmem:[%s3984_s3 + $0xc8] sm:$0xff] %vm2185_vm0, %v2172_v60 }
 0x3ea   : > { %v2174_v22 = vpop.xlane.xlu2 %2173 }
 0x3eb   : > { %2212 = vst.msk [vmem:[%s3984_s3 + $0xd0] sm:$0xff] %vm2185_vm0, %v2174_v22 }
 0x3f2   : > { %v2176_v61 = vpop.xlane.xlu0 %2175 }
 0x3f3   : > { %2213 = vst.msk [vmem:[%s3984_s3 + $0xd8] sm:$0xff] %vm2185_vm0, %v2176_v61 }
 0x3fa   : > { %v2178_v62 = vpop.xlane.xlu1 %2177 }
 0x3fb   : > { %2214 = vst.msk [vmem:[%s3984_s3 + $0xe0] sm:$0xff] %vm2185_vm0, %v2178_v62 }
 0x402   : > { %v2180_v63 = vpop.xlane.xlu2 %2179 }
 0x403   : > { %2215 = vst.msk [vmem:[%s3984_s3 + $0xe8] sm:$0xff] %vm2185_vm0, %v2180_v63 }
 0x40a   : > { %v2182_v0 = vpop.xlane.xlu0 %2181 }
 0x40b   : > { %2216 = vst.msk [vmem:[%s3984_s3 + $0xf0] sm:$0xff] %vm2185_vm0, %v2182_v0 }
 0x412   : > { %v2184_v1 = vpop.xlane.xlu1 %2183 }
 0x413   : > { %2217 = vst.msk [vmem:[%s3984_s3 + $0xf8] sm:$0xff] %vm2185_vm0, %v2184_v1 }
 0x414 PF: > { %s2257_s30 = sand.u32 1, %s3519_s13   ;;  %p4147_p13 = scmp.ge.s32.totalorder %s3531_s16, 2 }
 0x415   : > { %s2258_s2 = scalar_lea.sflag [#allocation4], %s2257_s30 }
 0x416   : > { %p2957_p11 = pnand %p4147_p13, %p3696_p4 }
 0x418   : > { %p2958_p0 = pneg %p2957_p11 }
 0x41a   : > { %3514 = dma.done.wait (%p2958_p0), %s2258_s2, 2048  }
 0x41b   : > { %3516 = vsyncadd (%p2958_p0), %s2258_s2, 4294965248  ;;  %p27_p2 = scmp.ge.s32.totalorder %s3671_s23, 4   ;;  %s4148_s13 = smov %s3523_s14 }
 0x41c   : > { %s4149_s14 = smov %s3527_s15  ;;  %s4150_s15 = smov %s3683_s1 }
 0x41d   : > { %s4151_s16 = smov %s3671_s23  ;;  %29 = sbr.rel (!%p27_p2) target bundleno = 13 (0xd), region = 133 }
 0x422   :  { %2272 = vsyncpa [#allocation3], 1 }
 0x423   :  { %2274 = vsyncpa [#allocation3 + $0x1], 1 }
 0x424   :  { %2275 = vsyncpa [#allocation6], 1 }
 0x425   :  { %2276 = vsyncpa [#allocation9], 1 }
 0x426   :  { %2277 = vsyncpa [#allocation12], 1 }
 0x427   :  { %2278 = vsyncpa [#allocation4], 1 }
 0x428   :  { %2280 = vsyncpa [#allocation4 + $0x1], 1 }

</bundles_post_ra>
